<compile_context>
chip_gen: v5e
topology: v5e:2x2
jax: 0.10.0
libtpu: 0.0.40
codegen_flags: <defaults>
</compile_context>

<pallas_src>
import functools

import jax
import jax.numpy as jnp
from jax.experimental import pallas as pl
from jax.experimental.pallas import tpu as pltpu


def _round_up(n: int, m: int) -> int:
    return ((n + m - 1) // m) * m


def finetune_kernel(x_ref, wb_ref, bb_ref, wf_ref, bf_ref, out_ref):
    # Cast x to bf16 in-kernel (VPU work, hidden under the MXU).
    x = x_ref[...].astype(jnp.bfloat16)
    # backbone: h = tanh(x @ Wb + bb)   (bf16 operands, f32 MXU accumulation)
    h = jnp.tanh(
        jnp.dot(x, wb_ref[...], preferred_element_type=jnp.float32) + bb_ref[...]
    )
    # fc: logits = h @ Wf^T + bf  (Wf pre-transposed + lane-padded at init;
    # padded class columns carry bias = finfo(f32).min -> softmax prob 0)
    logits = (
        jnp.dot(h.astype(wf_ref.dtype), wf_ref[...],
                preferred_element_type=jnp.float32)
        + bf_ref[...]
    )
    # Numerically stable softmax over the class (lane) axis, f32 throughout.
    m = jnp.max(logits, axis=1, keepdims=True)
    e = jnp.exp(logits - m)
    denom = jnp.sum(e, axis=1, keepdims=True)
    # Exact divide: rows sum to 1 to f32 rounding (approx reciprocal did not).
    out_ref[...] = (e / denom).astype(out_ref.dtype)


def prepare_finetune_params(wb, bb, wf, bf):
    """One-time (init) padding/casting of parameters — hoisted out of the
    per-call path so no pad/cast HLOs run every forward.

    wb: (D_in, E); bb: (E,); wf: (C, E) torch layout; bf: (C,).
    Returns lane-padded bf16 weights and f32 biases.
    """
    D_in, E = wb.shape
    C = wf.shape[0]
    Ep = _round_up(E, 128)
    Cp = _round_up(C, 128)
    neg = jnp.finfo(jnp.float32).min

    wb_p = jnp.pad(wb, ((0, 0), (0, Ep - E))).astype(jnp.bfloat16)        # (D_in, Ep)
    bb_p = jnp.pad(bb.reshape(1, E), ((0, 0), (0, Ep - E))).astype(jnp.float32)
    wf_p = jnp.pad(wf.T, ((0, Ep - E), (0, Cp - C))).astype(jnp.bfloat16)  # (Ep, Cp)
    # Padded class columns get a hugely negative bias -> exp underflows to 0.
    bf_p = jnp.pad(bf.reshape(1, C), ((0, 0), (0, Cp - C)),
                   constant_values=neg).astype(jnp.float32)
    return wb_p, bb_p, wf_p, bf_p


@functools.partial(jax.jit, static_argnames=("n_class", "tb"))
def finetune_forward(x, wb_p, bb_p, wf_p, bf_p, *, n_class: int, tb: int = 256):
    """x: (B, D_in) f32; padded params from prepare_finetune_params()."""
    B, D_in = x.shape
    Ep = wb_p.shape[1]
    Cp = wf_p.shape[1]

    # Only a ragged-batch row pad remains per call; D_in stays unpadded.
    TB = min(tb, _round_up(B, 8))
    Bp = _round_up(B, TB)
    if Bp != B:
        x = jnp.pad(x, ((0, Bp - B), (0, 0)))

    grid = (Bp // TB,)

    flops = 2 * Bp * D_in * Ep + 2 * Bp * Ep * Cp
    transcendentals = Bp * (Ep + Cp)          # tanh + exp
    bytes_accessed = (Bp * D_in * 4
                      + (wb_p.size + wf_p.size) * 2
                      + (bb_p.size + bf_p.size) * 4
                      + Bp * Cp * 4)

    out_p = pl.pallas_call(
        finetune_kernel,
        out_shape=jax.ShapeDtypeStruct((Bp, Cp), jnp.float32),
        grid=grid,
        in_specs=[
            pl.BlockSpec((TB, D_in), lambda i: (i, 0)),   # x: tiled over batch, unpadded D_in
            pl.BlockSpec((D_in, Ep), lambda i: (0, 0)),   # Wb: VMEM-resident
            pl.BlockSpec((1, Ep), lambda i: (0, 0)),      # bb
            pl.BlockSpec((Ep, Cp), lambda i: (0, 0)),     # Wf^T: VMEM-resident
            pl.BlockSpec((1, Cp), lambda i: (0, 0)),      # bf (padded cols = f32 min)
        ],
        out_specs=pl.BlockSpec((TB, Cp), lambda i: (i, 0)),
        compiler_params=pltpu.CompilerParams(
            dimension_semantics=("parallel",),            # batch axis is independent
        ),
        cost_estimate=pl.CostEstimate(
            flops=flops,
            transcendentals=transcendentals,
            bytes_accessed=bytes_accessed,
        ),
    )(x, wb_p, bb_p, wf_p, bf_p)

    return out_p[:B, :n_class]


if __name__ == "__main__":
    # Shapes consistent with the module: n_embedding=32, n_class=16, batch=256.
    B, D_in, E, C = 256, 32, 32, 16

    key = jax.random.PRNGKey(0)
    kx, kwb, kbb, kwf, kbf = jax.random.split(key, 5)

    x = jax.random.normal(kx, (B, D_in), dtype=jnp.float32)

    # TODO(synk): the real backbone is an arbitrary injected nn.Module; modeled
    # here as a deterministic dense+tanh layer producing the embedding.
    wb = jax.random.normal(kwb, (D_in, E), dtype=jnp.float32) * 0.1
    bb = jax.random.normal(kbb, (E,), dtype=jnp.float32) * 0.1
    wf = jax.random.normal(kwf, (C, E), dtype=jnp.float32) * 0.1  # torch (out, in)
    bf = jax.random.normal(kbf, (C,), dtype=jnp.float32) * 0.1

    # One-time parameter prep (hoisted out of the per-call path).
    wb_p, bb_p, wf_p, bf_p = prepare_finetune_params(wb, bb, wf, bf)

    out = jax.block_until_ready(
        finetune_forward(x, wb_p, bb_p, wf_p, bf_p, n_class=C)
    )

    # Reference in plain JAX with the same bf16-operand / f32-accumulate matmuls.
    # (bf16 MXU operands diverge slightly from a pure-f32 PyTorch FineTune; the
    #  2e-3 tolerance below documents that.)
    xb, wbb, wfb = (a.astype(jnp.bfloat16) for a in (x, wb, wf.T))
    h_ref = jnp.tanh(jnp.dot(xb, wbb, preferred_element_type=jnp.float32) + bb)
    logits_ref = jnp.dot(h_ref.astype(jnp.bfloat16), wfb,
                         preferred_element_type=jnp.float32) + bf
    probs_ref = jax.nn.softmax(logits_ref, axis=1)

    assert out.shape == (B, C)
    assert jnp.allclose(out, probs_ref, atol=2e-3), "mismatch vs reference"
    assert jnp.allclose(jnp.sum(out, axis=1), 1.0, atol=1e-3), "rows must sum to 1"

    print("KERNEL_OK")
</pallas_src>

<mosaic_0001>
module attributes {stable_mosaic.version = 11 : i64} {
  func.func @finetune_kernel(%arg0: i32, %arg1: memref<256x32xf32, #tpu.memory_space<vmem>>, %arg2: memref<32x128xbf16, #tpu.memory_space<vmem>>, %arg3: memref<1x128xf32, #tpu.memory_space<vmem>>, %arg4: memref<128x128xbf16, #tpu.memory_space<vmem>>, %arg5: memref<1x128xf32, #tpu.memory_space<vmem>>, %arg6: memref<256x128xf32, #tpu.memory_space<vmem>>) attributes {dimension_semantics = [#tpu.dimension_semantics<parallel>], iteration_bounds = array<i64: 1>, scalar_prefetch = 0 : i64, scratch_operands = 0 : i64, tpu.core_type = #tpu.core_type<tc>, window_params = [{transform_indices = @transform_0, window_bounds = array<i64: 256, 32>}, {pipeline_mode = #tpu.pipeline_mode<synchronous>, transform_indices = @transform_1, window_bounds = array<i64: 32, 128>}, {pipeline_mode = #tpu.pipeline_mode<synchronous>, transform_indices = @transform_2, window_bounds = array<i64: 1, 128>}, {pipeline_mode = #tpu.pipeline_mode<synchronous>, transform_indices = @transform_3, window_bounds = array<i64: 128, 128>}, {pipeline_mode = #tpu.pipeline_mode<synchronous>, transform_indices = @transform_4, window_bounds = array<i64: 1, 128>}, {transform_indices = @transform_5, window_bounds = array<i64: 256, 128>}]} {
    %c0 = arith.constant 0 : index
    %c0_0 = arith.constant 0 : index
    %0 = vector.load %arg1[%c0, %c0_0] : memref<256x32xf32, #tpu.memory_space<vmem>>, vector<256x32xf32>
    %1 = arith.truncf %0 : vector<256x32xf32> to vector<256x32xbf16>
    %c0_1 = arith.constant 0 : index
    %c0_2 = arith.constant 0 : index
    %2 = vector.load %arg2[%c0_1, %c0_2] : memref<32x128xbf16, #tpu.memory_space<vmem>>, vector<32x128xbf16>
    %cst = arith.constant dense<0.000000e+00> : vector<256x128xf32>
    %3 = tpu.matmul %1, %2, %cst {dimension_numbers = #tpu.dot_dimension_numbers<[1], [0], [0], [1], [0, 0, 1, 1], [], []>} : vector<256x32xbf16>, vector<32x128xbf16>, vector<256x128xf32> -> vector<256x128xf32>
    %c0_3 = arith.constant 0 : index
    %c0_4 = arith.constant 0 : index
    %4 = vector.load %arg3[%c0_3, %c0_4] : memref<1x128xf32, #tpu.memory_space<vmem>>, vector<1x128xf32>
    %5 = vector.broadcast %4 : vector<1x128xf32> to vector<256x128xf32>
    %6 = arith.addf %3, %5 : vector<256x128xf32>
    %7 = math.tanh %6 : vector<256x128xf32>
    %8 = arith.truncf %7 : vector<256x128xf32> to vector<256x128xbf16>
    %c0_5 = arith.constant 0 : index
    %c0_6 = arith.constant 0 : index
    %9 = vector.load %arg4[%c0_5, %c0_6] : memref<128x128xbf16, #tpu.memory_space<vmem>>, vector<128x128xbf16>
    %cst_7 = arith.constant dense<0.000000e+00> : vector<256x128xf32>
    %10 = tpu.matmul %8, %9, %cst_7 {dimension_numbers = #tpu.dot_dimension_numbers<[1], [0], [0], [1], [0, 0, 1, 1], [], []>} : vector<256x128xbf16>, vector<128x128xbf16>, vector<256x128xf32> -> vector<256x128xf32>
    %c0_8 = arith.constant 0 : index
    %c0_9 = arith.constant 0 : index
    %11 = vector.load %arg5[%c0_8, %c0_9] : memref<1x128xf32, #tpu.memory_space<vmem>>, vector<1x128xf32>
    %12 = vector.broadcast %11 : vector<1x128xf32> to vector<256x128xf32>
    %13 = arith.addf %10, %12 : vector<256x128xf32>
    %cst_10 = arith.constant dense<0xFF800000> : vector<256xf32>
    %14 = vector.multi_reduction <maximumf>, %13, %cst_10 [1] : vector<256x128xf32> to vector<256xf32>
    %15 = vector.shape_cast %14 : vector<256xf32> to vector<256x1xf32>
    %16 = vector.broadcast %15 : vector<256x1xf32> to vector<256x128xf32>
    %17 = arith.subf %13, %16 : vector<256x128xf32>
    %18 = math.exp %17 : vector<256x128xf32>
    %cst_11 = arith.constant dense<0.000000e+00> : vector<256xf32>
    %19 = vector.multi_reduction <add>, %18, %cst_11 [1] : vector<256x128xf32> to vector<256xf32>
    %20 = vector.shape_cast %19 : vector<256xf32> to vector<256x1xf32>
    %21 = vector.broadcast %20 : vector<256x1xf32> to vector<256x128xf32>
    %22 = arith.divf %18, %21 : vector<256x128xf32>
    %c0_12 = arith.constant 0 : index
    %c0_13 = arith.constant 0 : index
    %23 = vector.load %arg6[%c0_12, %c0_13] : memref<256x128xf32, #tpu.memory_space<vmem>>, vector<256x128xf32>
    tpu.vector_store %arg6[%c0_12, %c0_13], %22 {strides = array<i32>} : memref<256x128xf32, #tpu.memory_space<vmem>>, vector<256x128xf32>,
    return
  }
  func.func @transform_0(%arg0: i32) -> (i32, i32) {
    %c0_i32 = arith.constant 0 : i32
    %c0_i32_0 = arith.constant 0 : i32
    return %arg0, %c0_i32 : i32, i32
  }
  func.func @transform_1(%arg0: i32) -> (i32, i32) {
    %c0_i32 = arith.constant 0 : i32
    %c0_i32_0 = arith.constant 0 : i32
    %c0_i32_1 = arith.constant 0 : i32
    return %c0_i32, %c0_i32_0 : i32, i32
  }
  func.func @transform_2(%arg0: i32) -> (i32, i32) {
    %c0_i32 = arith.constant 0 : i32
    %c0_i32_0 = arith.constant 0 : i32
    %c0_i32_1 = arith.constant 0 : i32
    return %c0_i32, %c0_i32_0 : i32, i32
  }
  func.func @transform_3(%arg0: i32) -> (i32, i32) {
    %c0_i32 = arith.constant 0 : i32
    %c0_i32_0 = arith.constant 0 : i32
    %c0_i32_1 = arith.constant 0 : i32
    return %c0_i32, %c0_i32_0 : i32, i32
  }
  func.func @transform_4(%arg0: i32) -> (i32, i32) {
    %c0_i32 = arith.constant 0 : i32
    %c0_i32_0 = arith.constant 0 : i32
    %c0_i32_1 = arith.constant 0 : i32
    return %c0_i32, %c0_i32_0 : i32, i32
  }
  func.func @transform_5(%arg0: i32) -> (i32, i32) {
    %c0_i32 = arith.constant 0 : i32
    %c0_i32_0 = arith.constant 0 : i32
    return %arg0, %c0_i32 : i32, i32
  }
}

</mosaic_0001>

<bundles_post_ra>
// kernel: finetune_forward.1
= control target key start
LH: loop header
LB: loop body
LE: loop exit
PB: predicated region body
PF: predicated region fallthrough
CT: control target
= control target key end

     0   :  { %vm89_vm0 = vcmask 261120   ;;  %s2054_s1 = inlined_call_operand.vmem [shape: bf16[32,128], index: 1, kind: input, shape index: {}]   ;;  %s2055_s0 = inlined_call_operand.vmem [shape: f32[256,32], index: 0, kind: input, shape index: {}]   ;;  %s2056_s2 = inlined_call_operand.vmem [shape: f32[1,128], index: 2, kind: input, shape index: {}]   ;;  %s2057_s3 = inlined_call_operand.vmem [shape: bf16[128,128], index: 3, kind: input, shape index: {}]   ;;  %s2058_s4 = inlined_call_operand.vmem [shape: f32[1,128], index: 4, kind: input, shape index: {}]   ;;  %s2059_s5 = inlined_call_operand.vmem [shape: f32[256,128], index: 5, kind: output, shape index: {}]  }
   0x1   :  { %v1229_v0 = vld [vmem:[%s2054_s1 + $0x8] sm:$0xff]  ;;  %v1228_v1 = vld [vmem:[%s2054_s1] sm:$0xff]  ;;  %v23_v5 = vld [vmem:[%s2055_s0 + $0x10] sm:$0xff] }
   0x2   :  { %144 = vmatpush.bf16.msra.mxu0 %v1229_v0  ;;  %v21_v2 = vld [vmem:[%s2055_s0] sm:$0xff]  ;;  %v22_v3 = vld [vmem:[%s2055_s0 + $0x8] sm:$0xff]  ;;  %1238 = vmatpush.bf16.msra.mxu3 %v1229_v0  ;;  %v24_v6 = vld [vmem:[%s2055_s0 + $0x18] sm:$0xff] }
   0x3   :  { %v53_v4 = vpack.c.bf16 %v22_v3, %v21_v2  ;;  %v54_v7 = vpack.c.bf16 %v24_v6, %v23_v5  ;;  %v25_v8 = vld [vmem:[%s2055_s0 + $0x20] sm:$0xff]  ;;  %v26_v9 = vld [vmem:[%s2055_s0 + $0x28] sm:$0xff]  ;;  %v27_v11 = vld [vmem:[%s2055_s0 + $0x30] sm:$0xff] }
   0x4   :  { %v55_v10 = vpack.c.bf16 %v26_v9, %v25_v8  ;;  %v28_v12 = vld [vmem:[%s2055_s0 + $0x38] sm:$0xff]  ;;  %v29_v14 = vld [vmem:[%s2055_s0 + $0x40] sm:$0xff]  ;;  %v30_v15 = vld [vmem:[%s2055_s0 + $0x48] sm:$0xff] }
   0x5   :  { %v56_v13 = vpack.c.bf16 %v28_v12, %v27_v11  ;;  %v57_v16 = vpack.c.bf16 %v30_v15, %v29_v14  ;;  %v31_v17 = vld [vmem:[%s2055_s0 + $0x50] sm:$0xff]  ;;  %v32_v18 = vld [vmem:[%s2055_s0 + $0x58] sm:$0xff]  ;;  %v1235_v22 = vld [vmem:[%s2057_s3 + $0x28] sm:$0xff] }
   0x6   :  { %145 = vmatpush.bf16.msra.mxu0 %v1228_v1  ;;  %1239 = vmatpush.bf16.msra.mxu3 %v1228_v1  ;;  %v58_v19 = vpack.c.bf16 %v32_v18, %v31_v17  ;;  %v1237_v20 = vld [vmem:[%s2057_s3 + $0x38] sm:$0xff]  ;;  %v1236_v21 = vld [vmem:[%s2057_s3 + $0x30] sm:$0xff]  ;;  %v33_v23 = vld [vmem:[%s2055_s0 + $0x60] sm:$0xff] }
   0x7   :  { %343 = vmatpush.bf16.msra.mxu1 %v1237_v20  ;;  %1240 = vmatpush.bf16.msra.mxu2 %v1237_v20  ;;  %v34_v24 = vld [vmem:[%s2055_s0 + $0x68] sm:$0xff]  ;;  %v1234_v26 = vld [vmem:[%s2057_s3 + $0x20] sm:$0xff]  ;;  %v39_v27 = vld [vmem:[%s2055_s0 + $0x90] sm:$0xff] }
   0x8   :  { %v59_v25 = vpack.c.bf16 %v34_v24, %v33_v23  ;;  %v40_v28 = vld [vmem:[%s2055_s0 + $0x98] sm:$0xff]  ;;  %v1232_v31 = vld [vmem:[%s2057_s3 + $0x10] sm:$0xff]  ;;  %v1231_v32 = vld [vmem:[%s2057_s3 + $0x8] sm:$0xff] }
   0x9   :  { %1180 = vmatmul.msk.bf16.vlgmr.msra.gmra.mxu0 %vm89_vm0, %v53_v4  ;;  %v62_v29 = vpack.c.bf16 %v40_v28, %v39_v27  ;;  %v1233_v30 = vld [vmem:[%s2057_s3 + $0x18] sm:$0xff]  ;;  %v35_v33 = vld [vmem:[%s2055_s0 + $0x70] sm:$0xff]  ;;  %v1230_v36 = vld [vmem:[%s2057_s3] sm:$0xff] }
   0xa   :  { %v36_v34 = vld [vmem:[%s2055_s0 + $0x78] sm:$0xff]  ;;  %v41_v37 = vld [vmem:[%s2055_s0 + $0xa0] sm:$0xff]  ;;  %v42_v38 = vld [vmem:[%s2055_s0 + $0xa8] sm:$0xff] }
   0xb   :  { %344 = vmatpush.bf16.msra.mxu1 %v1236_v21  ;;  %1241 = vmatpush.bf16.msra.mxu2 %v1236_v21  ;;  %v60_v35 = vpack.c.bf16 %v36_v34, %v35_v33  ;;  %v63_v39 = vpack.c.bf16 %v42_v38, %v41_v37  ;;  %v37_v40 = vld [vmem:[%s2055_s0 + $0x80] sm:$0xff]  ;;  %v38_v41 = vld [vmem:[%s2055_s0 + $0x88] sm:$0xff]  ;;  %v43_v45 = vld [vmem:[%s2055_s0 + $0xb0] sm:$0xff] }
   0xc   :  { %1189 = vmatmul.msk.bf16.vlgmr.msra.gmra.mxu3 %vm89_vm0, %v62_v29  ;;  %v61_v42 = vpack.c.bf16 %v38_v41, %v37_v40  ;;  %v1581_v44 = vld [vmem:[%s2056_s2] ss:$0 sm:$0xff]  ;;  %v44_v46 = vld [vmem:[%s2055_s0 + $0xb8] sm:$0xff]  ;;  %v46_v56 = vld [vmem:[%s2055_s0 + $0xc8] sm:$0xff] }
   0xd   :  { %v64_v47 = vpack.c.bf16 %v44_v46, %v43_v45  ;;  %v45_v55 = vld [vmem:[%s2055_s0 + $0xc0] sm:$0xff]  ;;  %v47_v1 = vld [vmem:[%s2055_s0 + $0xd0] sm:$0xff]  ;;  %v48_v2 = vld [vmem:[%s2055_s0 + $0xd8] sm:$0xff] }
   0xe   :  { %v65_v57 = vpack.c.bf16 %v46_v56, %v45_v55  ;;  %v66_v3 = vpack.c.bf16 %v48_v2, %v47_v1  ;;  %v49_v11 = vld [vmem:[%s2055_s0 + $0xe0] sm:$0xff]  ;;  %v50_v12 = vld [vmem:[%s2055_s0 + $0xe8] sm:$0xff]  ;;  %v51_v21 = vld [vmem:[%s2055_s0 + $0xf0] sm:$0xff] }
   0xf   :  { %345 = vmatpush.bf16.msra.mxu1 %v1235_v22  ;;  %1242 = vmatpush.bf16.msra.mxu2 %v1235_v22  ;;  %v52_v22 = vld [vmem:[%s2055_s0 + $0xf8] sm:$0xff] }
  0x10   :  { %v68_v23 = vpack.c.bf16 %v52_v22, %v51_v21 }
  0x13   :  { %346 = vmatpush.bf16.msra.mxu1 %v1234_v26  ;;  %1243 = vmatpush.bf16.msra.mxu2 %v1234_v26 }
  0x17   :  { %347 = vmatpush.bf16.msra.mxu1 %v1233_v30  ;;  %1244 = vmatpush.bf16.msra.mxu2 %v1233_v30 }
  0x19   :  { %1181 = vmatmul.msk.bf16.gmra.mxu0 %vm89_vm0, %v54_v7 }
  0x1b   :  { %348 = vmatpush.bf16.msra.mxu1 %v1232_v31  ;;  %1245 = vmatpush.bf16.msra.mxu2 %v1232_v31 }
  0x1c   :  { %1190 = vmatmul.msk.bf16.gmra.mxu3 %vm89_vm0, %v63_v39 }
  0x1f   :  { %349 = vmatpush.bf16.msra.mxu1 %v1231_v32  ;;  %1246 = vmatpush.bf16.msra.mxu2 %v1231_v32 }
  0x23   :  { %350 = vmatpush.bf16.msra.mxu1 %v1230_v36  ;;  %1247 = vmatpush.bf16.msra.mxu2 %v1230_v36 }
  0x29   :  { %1182 = vmatmul.msk.bf16.gmra.mxu0 %vm89_vm0, %v55_v10 }
  0x2c   :  { %1191 = vmatmul.msk.bf16.gmra.mxu3 %vm89_vm0, %v64_v47 }
  0x39   :  { %1183 = vmatmul.msk.bf16.gmra.mxu0 %vm89_vm0, %v56_v13  ;;  %v67_v13 = vpack.c.bf16 %v50_v12, %v49_v11 }
  0x3c   :  { %1192 = vmatmul.msk.bf16.gmra.mxu3 %vm89_vm0, %v65_v57 }
  0x49   :  { %1184 = vmatmul.msk.bf16.gmra.mxu0 %vm89_vm0, %v57_v16 }
  0x4c   :  { %1193 = vmatmul.msk.bf16.gmra.mxu3 %vm89_vm0, %v66_v3 }
  0x59   :  { %1185 = vmatmul.msk.bf16.gmra.mxu0 %vm89_vm0, %v58_v19 }
  0x5c   :  { %1194 = vmatmul.msk.bf16.gmra.mxu3 %vm89_vm0, %v67_v13 }
  0x69   :  { %1186 = vmatmul.msk.bf16.gmra.mxu0 %vm89_vm0, %v59_v25 }
  0x6c   :  { %1195 = vmatmul.msk.bf16.gmra.mxu3 %vm89_vm0, %v68_v23 }
  0x79   :  { %1187 = vmatmul.msk.bf16.gmra.mxu0 %vm89_vm0, %v60_v35 }
  0x86   :  { %v147_v43 = vpop.f32.mrf.mxu0 }
  0x87   :  { %v148_v48 = vadd.f32 %v1581_v44, %v147_v43 }
  0x89   :  { %1188 = vmatmul.msk.bf16.gmra.mxu0 %vm89_vm0, %v61_v42  ;;  %1250 = vtanh.f32 %v148_v48 }
  0x8e   :  { %v149_v49 = vpop.f32.mrf.mxu0 }
  0x8f   :  { %v150_v50 = vadd.f32 %v1581_v44, %v149_v49  ;;  %v1251_v51 = vpop.eup %1250  ;;  %v192_v43 = vpop.f32.mrf.mxu3 }
  0x90   :  { %v193_v2 = vadd.f32 %v1581_v44, %v192_v43 }
  0x91   :  { %1252 = vtanh.f32 %v150_v50 }
  0x96   :  { %v152_v52 = vpop.f32.mrf.mxu0 }
  0x97   :  { %v1253_v53 = vpop.eup %1252  ;;  %v153_v58 = vadd.f32 %v1581_v44, %v152_v52  ;;  %v194_v50 = vpop.f32.mrf.mxu3 }
  0x98   :  { %v259_v54 = vpack.c.bf16 %v1253_v53, %v1251_v51  ;;  %v195_v3 = vadd.f32 %v1581_v44, %v194_v50 }
  0x99   :  { %1254 = vtanh.f32 %v153_v58 }
  0x9a   :  { %351 = vmatmul.bf16.vlgmr.msra.gmra.mxu1 %v259_v54 }
  0x9e   :  { %v154_v59 = vpop.f32.mrf.mxu0 }
  0x9f   :  { %v155_v60 = vadd.f32 %v1581_v44, %v154_v59  ;;  %v1255_v61 = vpop.eup %1254  ;;  %v197_v55 = vpop.f32.mrf.mxu3  ;;  %v1640_v59 = vld [vmem:[%s2058_s4] ss:$0 sm:$0xff] }
  0xa0   :  { %v198_v13 = vadd.f32 %v1581_v44, %v197_v55 }
  0xa1   :  { %1256 = vtanh.f32 %v155_v60 }
  0xa6   :  { %v157_v62 = vpop.f32.mrf.mxu0 }
  0xa7   :  { %v1257_v63 = vpop.eup %1256  ;;  %v158_v4 = vadd.f32 %v1581_v44, %v157_v62  ;;  %v199_v60 = vpop.f32.mrf.mxu3 }
  0xa8   :  { %v260_v0 = vpack.c.bf16 %v1257_v63, %v1255_v61 }
  0xa9   :  { %1258 = vtanh.f32 %v158_v4 }
  0xaa   :  { %356 = vmatmul.bf16.gmra.mxu1 %v260_v0 }
  0xae   :  { %v159_v5 = vpop.f32.mrf.mxu0 }
  0xaf   :  { %v160_v6 = vadd.f32 %v1581_v44, %v159_v5  ;;  %v1259_v7 = vpop.eup %1258  ;;  %v202_v4 = vpop.f32.mrf.mxu3 }
  0xb0   :  { %v203_v23 = vadd.f32 %v1581_v44, %v202_v4 }
  0xb1   :  { %1260 = vtanh.f32 %v160_v6 }
  0xb6   :  { %v162_v8 = vpop.f32.mrf.mxu0 }
  0xb7   :  { %v1261_v9 = vpop.eup %1260  ;;  %v163_v14 = vadd.f32 %v1581_v44, %v162_v8  ;;  %v204_v12 = vpop.f32.mrf.mxu3 }
  0xb8   :  { %v261_v10 = vpack.c.bf16 %v1261_v9, %v1259_v7 }
  0xb9   :  { %1262 = vtanh.f32 %v163_v14  ;;  %v200_v14 = vadd.f32 %v1581_v44, %v199_v60 }
  0xba   :  { %361 = vmatmul.bf16.gmra.mxu1 %v261_v10 }
  0xbe   :  { %v164_v15 = vpop.f32.mrf.mxu0 }
  0xbf   :  { %v165_v16 = vadd.f32 %v1581_v44, %v164_v15  ;;  %v1263_v17 = vpop.eup %1262 }
  0xc1   :  { %1264 = vtanh.f32 %v165_v16 }
  0xc6   :  { %v167_v18 = vpop.f32.mrf.mxu0 }
  0xc7   :  { %v1265_v19 = vpop.eup %1264  ;;  %v168_v24 = vadd.f32 %v1581_v44, %v167_v18 }
  0xc8   :  { %v262_v20 = vpack.c.bf16 %v1265_v19, %v1263_v17  ;;  %v207_v17 = vpop.f32.mrf.mxu3 }
  0xc9   :  { %1266 = vtanh.f32 %v168_v24  ;;  %v205_v24 = vadd.f32 %v1581_v44, %v204_v12 }
  0xca   :  { %366 = vmatmul.bf16.gmra.mxu1 %v262_v20 }
  0xce   :  { %v169_v25 = vpop.f32.mrf.mxu0 }
  0xcf   :  { %v170_v26 = vadd.f32 %v1581_v44, %v169_v25  ;;  %v1267_v27 = vpop.eup %1266 }
  0xd0   :  { %v209_v25 = vpop.f32.mrf.mxu3 }
  0xd1   :  { %1268 = vtanh.f32 %v170_v26 }
  0xd6   :  { %v172_v28 = vpop.f32.mrf.mxu0 }
  0xd7   :  { %v1269_v29 = vpop.eup %1268  ;;  %v173_v31 = vadd.f32 %v1581_v44, %v172_v28 }
  0xd8   :  { %v263_v30 = vpack.c.bf16 %v1269_v29, %v1267_v27 }
  0xd9   :  { %1270 = vtanh.f32 %v173_v31 }
  0xda   :  { %371 = vmatmul.bf16.gmra.mxu1 %v263_v30  ;;  %v212_v30 = vpop.f32.mrf.mxu3 }
  0xde   :  { %v174_v32 = vpop.f32.mrf.mxu0 }
  0xdf   :  { %v175_v33 = vadd.f32 %v1581_v44, %v174_v32  ;;  %v1271_v34 = vpop.eup %1270 }
  0xe1   :  { %1272 = vtanh.f32 %v175_v33 }
  0xe6   :  { %v177_v35 = vpop.f32.mrf.mxu0 }
  0xe7   :  { %v1273_v36 = vpop.eup %1272  ;;  %v178_v38 = vadd.f32 %v1581_v44, %v177_v35  ;;  %v210_v35 = vadd.f32 %v1581_v44, %v209_v25 }
  0xe8   :  { %v264_v37 = vpack.c.bf16 %v1273_v36, %v1271_v34  ;;  %v208_v34 = vadd.f32 %v1581_v44, %v207_v17 }
  0xe9   :  { %1274 = vtanh.f32 %v178_v38  ;;  %v214_v38 = vpop.f32.mrf.mxu3 }
  0xea   :  { %376 = vmatmul.bf16.gmra.mxu1 %v264_v37 }
  0xee   :  { %v179_v39 = vpop.f32.mrf.mxu0 }
  0xef   :  { %v180_v40 = vadd.f32 %v1581_v44, %v179_v39  ;;  %v1275_v41 = vpop.eup %1274 }
  0xf1   :  { %1276 = vtanh.f32 %v180_v40 }
  0xf6   :  { %v182_v42 = vpop.f32.mrf.mxu0 }
  0xf7   :  { %v1277_v45 = vpop.eup %1276  ;;  %v183_v47 = vadd.f32 %v1581_v44, %v182_v42 }
  0xf8   :  { %v265_v46 = vpack.c.bf16 %v1277_v45, %v1275_v41  ;;  %v213_v45 = vadd.f32 %v1581_v44, %v212_v30 }
  0xf9   :  { %1278 = vtanh.f32 %v183_v47  ;;  %v215_v47 = vadd.f32 %v1581_v44, %v214_v38 }
  0xfa   :  { %381 = vmatmul.bf16.gmra.mxu1 %v265_v46  ;;  %v217_v46 = vpop.f32.mrf.mxu3 }
  0xfe   :  { %v184_v48 = vpop.f32.mrf.mxu0 }
  0xff   :  { %v185_v49 = vadd.f32 %v1581_v44, %v184_v48  ;;  %v1279_v51 = vpop.eup %1278 }
 0x101   :  { %1280 = vtanh.f32 %v185_v49 }
 0x106   :  { %v187_v52 = vpop.f32.mrf.mxu0 }
 0x107   :  { %v1281_v53 = vpop.eup %1280  ;;  %v188_v56 = vadd.f32 %v1581_v44, %v187_v52 }
 0x108   :  { %v266_v54 = vpack.c.bf16 %v1281_v53, %v1279_v51  ;;  %v219_v51 = vpop.f32.mrf.mxu3 }
 0x109   :  { %1282 = vtanh.f32 %v188_v56  ;;  %v218_v56 = vadd.f32 %v1581_v44, %v217_v46 }
 0x10a   :  { %386 = vmatmul.bf16.gmra.mxu1 %v266_v54 }
 0x10e   :  { %v189_v57 = vpop.f32.mrf.mxu0 }
 0x10f   :  { %v190_v58 = vadd.f32 %v1581_v44, %v189_v57  ;;  %v1283_v61 = vpop.eup %1282  ;;  %v220_v57 = vadd.f32 %v1581_v44, %v219_v51 }
 0x111   :  { %1284 = vtanh.f32 %v190_v58  ;;  %v222_v58 = vpop.f32.mrf.mxu3 }
 0x112   :  { %1286 = vtanh.f32 %v193_v2 }
 0x113   :  { %1288 = vtanh.f32 %v195_v3 }
 0x114   :  { %1290 = vtanh.f32 %v198_v13 }
 0x115   :  { %1292 = vtanh.f32 %v200_v14 }
 0x116   :  { %1294 = vtanh.f32 %v203_v23 }
 0x117   :  { %v1285_v62 = vpop.eup %1284  ;;  %v352_v63 = vpop.f32.mrf.mxu1  ;;  %1296 = vtanh.f32 %v205_v24 }
 0x118   :  { %v1643_v0 = vadd.f32 %v1640_v59, %v352_v63  ;;  %v267_v1 = vpack.c.bf16 %v1285_v62, %v1283_v61  ;;  %v1287_v7 = vpop.eup %1286  ;;  %1298 = vtanh.f32 %v208_v34 }
 0x119   :  { %v1289_v8 = vpop.eup %1288  ;;  %1300 = vtanh.f32 %v210_v35  ;;  %v224_v2 = vpop.f32.mrf.mxu3 }
 0x11a   :  { %391 = vmatmul.bf16.vlgmr.msra.gmra.mxu2 %v267_v1  ;;  %432 = vmax.xlane.f32.xlu0 %v1643_v0  ;;  %v268_v11 = vpack.c.bf16 %v1289_v8, %v1287_v7  ;;  %v1291_v18 = vpop.eup %1290  ;;  %1302 = vtanh.f32 %v213_v45  ;;  %v225_v7 = vadd.f32 %v1581_v44, %v224_v2 }
 0x11b   :  { %v1293_v19 = vpop.eup %1292  ;;  %1304 = vtanh.f32 %v215_v47 }
 0x11c   :  { %v269_v22 = vpack.c.bf16 %v1293_v19, %v1291_v18  ;;  %v1295_v28 = vpop.eup %1294  ;;  %1306 = vtanh.f32 %v218_v56 }
 0x11d   :  { %v1297_v29 = vpop.eup %1296  ;;  %1308 = vtanh.f32 %v220_v57 }
 0x11e   :  { %v270_v33 = vpack.c.bf16 %v1297_v29, %v1295_v28  ;;  %v1299_v39 = vpop.eup %1298 }
 0x11f   :  { %v354_v5 = vpop.f32.mrf.mxu1  ;;  %v1301_v40 = vpop.eup %1300 }
 0x120   :  { %v1649_v6 = vadd.f32 %v1640_v59, %v354_v5  ;;  %v271_v43 = vpack.c.bf16 %v1301_v40, %v1299_v39  ;;  %v1303_v50 = vpop.eup %1302  ;;  %v223_v5 = vadd.f32 %v1581_v44, %v222_v58 }
 0x121   :  { %v1305_v52 = vpop.eup %1304 }
 0x122   :  { %434 = vmax.xlane.f32.xlu0 %v1649_v6  ;;  %v272_v55 = vpack.c.bf16 %v1305_v52, %v1303_v50  ;;  %v1307_v62 = vpop.eup %1306  ;;  %1310 = vtanh.f32 %v223_v5 }
 0x123   :  { %v1309_v63 = vpop.eup %1308  ;;  %1312 = vtanh.f32 %v225_v7 }
 0x124   :  { %v273_v4 = vpack.c.bf16 %v1309_v63, %v1307_v62 }
 0x127   :  { %v357_v9 = vpop.f32.mrf.mxu1 }
 0x128   :  { %v1653_v10 = vadd.f32 %v1640_v59, %v357_v9 }
 0x12a   :  { %396 = vmatmul.bf16.gmra.mxu2 %v268_v11  ;;  %436 = vmax.xlane.f32.xlu1 %v1653_v10  ;;  %v1311_v11 = vpop.eup %1310 }
 0x12b   :  { %v1313_v12 = vpop.eup %1312 }
 0x12f   :  { %v359_v15 = vpop.f32.mrf.mxu1 }
 0x130   :  { %v1659_v16 = vadd.f32 %v1640_v59, %v359_v15  ;;  %v274_v15 = vpack.c.bf16 %v1313_v12, %v1311_v11 }
 0x132   :  { %438 = vmax.xlane.f32.xlu1 %v1659_v16 }
 0x137   :  { %v362_v20 = vpop.f32.mrf.mxu1 }
 0x138   :  { %v1663_v21 = vadd.f32 %v1640_v59, %v362_v20 }
 0x13a   :  { %401 = vmatmul.bf16.gmra.mxu2 %v269_v22  ;;  %440 = vmax.xlane.f32.xlu2 %v1663_v21 }
 0x13f   :  { %v364_v26 = vpop.f32.mrf.mxu1 }
 0x140   :  { %v1669_v27 = vadd.f32 %v1640_v59, %v364_v26 }
 0x142   :  { %442 = vmax.xlane.f32.xlu2 %v1669_v27 }
 0x147   :  { %v367_v31 = vpop.f32.mrf.mxu1 }
 0x148   :  { %v1673_v32 = vadd.f32 %v1640_v59, %v367_v31 }
 0x14a   :  { %406 = vmatmul.bf16.gmra.mxu2 %v270_v33  ;;  %444 = vmax.xlane.f32.xlu0 %v1673_v32 }
 0x14f   :  { %v369_v36 = vpop.f32.mrf.mxu1 }
 0x150   :  { %v1679_v37 = vadd.f32 %v1640_v59, %v369_v36 }
 0x152   :  { %446 = vmax.xlane.f32.xlu1 %v1679_v37 }
 0x157   :  { %v372_v41 = vpop.f32.mrf.mxu1 }
 0x158   :  { %v1683_v42 = vadd.f32 %v1640_v59, %v372_v41 }
 0x15a   :  { %411 = vmatmul.bf16.gmra.mxu2 %v271_v43  ;;  %448 = vmax.xlane.f32.xlu2 %v1683_v42 }
 0x15f   :  { %v374_v48 = vpop.f32.mrf.mxu1 }
 0x160   :  { %v1689_v49 = vadd.f32 %v1640_v59, %v374_v48 }
 0x162   :  { %450 = vmax.xlane.f32.xlu0 %v1689_v49 }
 0x167   :  { %v377_v53 = vpop.f32.mrf.mxu1 }
 0x168   :  { %v1693_v54 = vadd.f32 %v1640_v59, %v377_v53 }
 0x16a   :  { %416 = vmatmul.bf16.gmra.mxu2 %v272_v55  ;;  %452 = vmax.xlane.f32.xlu1 %v1693_v54 }
 0x16f   :  { %v379_v60 = vpop.f32.mrf.mxu1 }
 0x170   :  { %v1699_v61 = vadd.f32 %v1640_v59, %v379_v60 }
 0x172   :  { %454 = vmax.xlane.f32.xlu2 %v1699_v61 }
 0x177   :  { %v382_v1 = vpop.f32.mrf.mxu1 }
 0x178   :  { %v1703_v3 = vadd.f32 %v1640_v59, %v382_v1 }
 0x17a   :  { %421 = vmatmul.bf16.gmra.mxu2 %v273_v4  ;;  %456 = vmax.xlane.f32.xlu0 %v1703_v3 }
 0x17f   :  { %v384_v8 = vpop.f32.mrf.mxu1 }
 0x180   :  { %v1709_v9 = vadd.f32 %v1640_v59, %v384_v8 }
 0x182   :  { %458 = vmax.xlane.f32.xlu1 %v1709_v9 }
 0x187   :  { %v387_v13 = vpop.f32.mrf.mxu1 }
 0x188   :  { %v1713_v14 = vadd.f32 %v1640_v59, %v387_v13 }
 0x18a   :  { %426 = vmatmul.bf16.gmra.mxu2 %v274_v15  ;;  %460 = vmax.xlane.f32.xlu2 %v1713_v14 }
 0x18d   :  { %v433_v17 = vpop.xlane.xlu0 %432 }
 0x18e   :  { %v496_v44 = vsub.f32 %v1643_v0, %v433_v17 }
 0x18f   :  { %v389_v18 = vpop.f32.mrf.mxu1 }
 0x190   :  { %v528_v19 = vmul.f32 1.442695, %v496_v44  ;;  %v1718_v20 = vadd.f32 %v1640_v59, %v389_v18 }
 0x192   :  { %1314 = vpow2.f32 %v528_v19  ;;  %462 = vmax.xlane.f32.xlu0 %v1718_v20 }
 0x195   :  { %v435_v22 = vpop.xlane.xlu0 %434 }
 0x196   :  { %v497_v23 = vsub.f32 %v1649_v6, %v435_v22 }
 0x198   :  { %v1722_v24 = vpop.eup %1314  ;;  %v530_v25 = vmul.f32 1.442695, %v497_v23 }
 0x199   :  { %592 = vadd.xlane.f32.xlu2 %v1722_v24 }
 0x19a   :  { %1316 = vpow2.f32 %v530_v25 }
 0x19d   :  { %v392_v26 = vpop.f32.mrf.mxu2  ;;  %v437_v28 = vpop.xlane.xlu1 %436 }
 0x19e   :  { %v1726_v0 = vadd.f32 %v1640_v59, %v392_v26  ;;  %v498_v29 = vsub.f32 %v1653_v10, %v437_v28 }
 0x1a0   :  { %v1729_v30 = vpop.eup %1316  ;;  %v532_v31 = vmul.f32 1.442695, %v498_v29  ;;  %464 = vmax.xlane.f32.xlu1 %v1726_v0 }
 0x1a1   :  { %594 = vadd.xlane.f32.xlu0 %v1729_v30 }
 0x1a2   :  { %1318 = vpow2.f32 %v532_v31 }
 0x1a5   :  { %v394_v6 = vpop.f32.mrf.mxu2  ;;  %v439_v33 = vpop.xlane.xlu1 %438 }
 0x1a6   :  { %v1734_v34 = vadd.f32 %v1640_v59, %v394_v6  ;;  %v499_v35 = vsub.f32 %v1659_v16, %v439_v33 }
 0x1a8   :  { %v1737_v36 = vpop.eup %1318  ;;  %v534_v38 = vmul.f32 1.442695, %v499_v35  ;;  %466 = vmax.xlane.f32.xlu2 %v1734_v34 }
 0x1a9   :  { %596 = vadd.xlane.f32.xlu1 %v1737_v36 }
 0x1aa   :  { %1320 = vpow2.f32 %v534_v38 }
 0x1ad   :  { %v397_v10 = vpop.f32.mrf.mxu2  ;;  %v441_v39 = vpop.xlane.xlu2 %440 }
 0x1ae   :  { %v1742_v40 = vadd.f32 %v1640_v59, %v397_v10  ;;  %v500_v41 = vsub.f32 %v1663_v21, %v441_v39 }
 0x1b0   :  { %v1745_v43 = vpop.eup %1320  ;;  %v536_v45 = vmul.f32 1.442695, %v500_v41  ;;  %468 = vmax.xlane.f32.xlu0 %v1742_v40 }
 0x1b1   :  { %598 = vadd.xlane.f32.xlu2 %v1745_v43 }
 0x1b2   :  { %1322 = vpow2.f32 %v536_v45 }
 0x1b5   :  { %v399_v16 = vpop.f32.mrf.mxu2  ;;  %v443_v46 = vpop.xlane.xlu2 %442 }
 0x1b6   :  { %v1750_v47 = vadd.f32 %v1640_v59, %v399_v16  ;;  %v501_v48 = vsub.f32 %v1669_v27, %v443_v46 }
 0x1b8   :  { %v1753_v50 = vpop.eup %1322  ;;  %v538_v51 = vmul.f32 1.442695, %v501_v48  ;;  %470 = vmax.xlane.f32.xlu1 %v1750_v47 }
 0x1b9   :  { %600 = vadd.xlane.f32.xlu0 %v1753_v50 }
 0x1ba   :  { %1324 = vpow2.f32 %v538_v51 }
 0x1bd   :  { %v402_v21 = vpop.f32.mrf.mxu2  ;;  %v445_v52 = vpop.xlane.xlu0 %444 }
 0x1be   :  { %v1758_v53 = vadd.f32 %v1640_v59, %v402_v21  ;;  %v502_v55 = vsub.f32 %v1673_v32, %v445_v52 }
 0x1c0   :  { %v1761_v56 = vpop.eup %1324  ;;  %v540_v57 = vmul.f32 1.442695, %v502_v55  ;;  %472 = vmax.xlane.f32.xlu2 %v1758_v53 }
 0x1c1   :  { %602 = vadd.xlane.f32.xlu1 %v1761_v56 }
 0x1c2   :  { %1326 = vpow2.f32 %v540_v57 }
 0x1c5   :  { %v404_v27 = vpop.f32.mrf.mxu2  ;;  %v447_v58 = vpop.xlane.xlu1 %446 }
 0x1c6   :  { %v1766_v60 = vadd.f32 %v1640_v59, %v404_v27  ;;  %v503_v62 = vsub.f32 %v1679_v37, %v447_v58 }
 0x1c8   :  { %v1769_v63 = vpop.eup %1326  ;;  %v542_v1 = vmul.f32 1.442695, %v503_v62  ;;  %474 = vmax.xlane.f32.xlu0 %v1766_v60 }
 0x1c9   :  { %604 = vadd.xlane.f32.xlu2 %v1769_v63 }
 0x1ca   :  { %1328 = vpow2.f32 %v542_v1 }
 0x1cd   :  { %v407_v32 = vpop.f32.mrf.mxu2  ;;  %v449_v2 = vpop.xlane.xlu2 %448 }
 0x1ce   :  { %v1774_v4 = vadd.f32 %v1640_v59, %v407_v32  ;;  %v504_v5 = vsub.f32 %v1683_v42, %v449_v2 }
 0x1d0   :  { %v1777_v7 = vpop.eup %1328  ;;  %v544_v8 = vmul.f32 1.442695, %v504_v5  ;;  %476 = vmax.xlane.f32.xlu1 %v1774_v4 }
 0x1d1   :  { %606 = vadd.xlane.f32.xlu0 %v1777_v7 }
 0x1d2   :  { %1330 = vpow2.f32 %v544_v8 }
 0x1d5   :  { %v409_v37 = vpop.f32.mrf.mxu2  ;;  %v451_v11 = vpop.xlane.xlu0 %450 }
 0x1d6   :  { %v1782_v12 = vadd.f32 %v1640_v59, %v409_v37  ;;  %v505_v13 = vsub.f32 %v1689_v49, %v451_v11 }
 0x1d8   :  { %v1785_v15 = vpop.eup %1330  ;;  %v546_v17 = vmul.f32 1.442695, %v505_v13  ;;  %478 = vmax.xlane.f32.xlu2 %v1782_v12 }
 0x1d9   :  { %608 = vadd.xlane.f32.xlu1 %v1785_v15 }
 0x1da   :  { %1332 = vpow2.f32 %v546_v17 }
 0x1dd   :  { %v412_v42 = vpop.f32.mrf.mxu2  ;;  %v453_v44 = vpop.xlane.xlu1 %452 }
 0x1de   :  { %v1790_v18 = vadd.f32 %v1640_v59, %v412_v42  ;;  %v506_v19 = vsub.f32 %v1693_v54, %v453_v44 }
 0x1e0   :  { %v1793_v22 = vpop.eup %1332  ;;  %v548_v23 = vmul.f32 1.442695, %v506_v19  ;;  %480 = vmax.xlane.f32.xlu0 %v1790_v18 }
 0x1e1   :  { %610 = vadd.xlane.f32.xlu2 %v1793_v22 }
 0x1e2   :  { %1334 = vpow2.f32 %v548_v23 }
 0x1e5   :  { %v414_v49 = vpop.f32.mrf.mxu2  ;;  %v455_v6 = vpop.xlane.xlu2 %454 }
 0x1e6   :  { %v1798_v25 = vadd.f32 %v1640_v59, %v414_v49  ;;  %v507_v62 = vsub.f32 %v1699_v61, %v455_v6 }
 0x1e8   :  { %v1800_v26 = vpop.eup %1334  ;;  %482 = vmax.xlane.f32.xlu1 %v1798_v25  ;;  %v550_v5 = vmul.f32 1.442695, %v507_v62 }
 0x1e9   :  { %612 = vadd.xlane.f32.xlu0 %v1800_v26 }
 0x1ed   :  { %v417_v28 = vpop.f32.mrf.mxu2  ;;  %v457_v35 = vpop.xlane.xlu0 %456 }
 0x1ee   :  { %v1805_v54 = vadd.f32 %v1640_v59, %v417_v28  ;;  %v508_v10 = vsub.f32 %v1703_v3, %v457_v35 }
 0x1f0   :  { %484 = vmax.xlane.f32.xlu2 %v1805_v54  ;;  %v552_v41 = vmul.f32 1.442695, %v508_v10 }
 0x1f2   :  { %1336 = vpow2.f32 %v552_v41 }
 0x1f5   :  { %v419_v29 = vpop.f32.mrf.mxu2  ;;  %v459_v16 = vpop.xlane.xlu1 %458 }
 0x1f6   :  { %v1809_v31 = vadd.f32 %v1640_v59, %v419_v29  ;;  %v509_v51 = vsub.f32 %v1709_v9, %v459_v16 }
 0x1f8   :  { %486 = vmax.xlane.f32.xlu0 %v1809_v31  ;;  %v554_v55 = vmul.f32 1.442695, %v509_v51  ;;  %v1826_v58 = vpop.eup %1336 }
 0x1fd   :  { %v422_v33 = vpop.f32.mrf.mxu2  ;;  %v461_v39 = vpop.xlane.xlu2 %460 }
 0x1fe   :  { %v1813_v38 = vadd.f32 %v1640_v59, %v422_v33 }
 0x200   :  { %488 = vmax.xlane.f32.xlu1 %v1813_v38 }
 0x205   :  { %v424_v45 = vpop.f32.mrf.mxu2  ;;  %v463_v48 = vpop.xlane.xlu0 %462 }
 0x206   :  { %v1818_v46 = vadd.f32 %v1640_v59, %v424_v45  ;;  %v511_v21 = vsub.f32 %v1718_v20, %v463_v48 }
 0x208   :  { %490 = vmax.xlane.f32.xlu2 %v1818_v46  ;;  %v558_v3 = vmul.f32 1.442695, %v511_v21 }
 0x20c   :  { %v593_v52 = vpop.xlane.xlu2 %592 }
 0x20d   :  { %1338 = vrcp.f32 %v593_v52  ;;  %v427_v57 = vpop.f32.mrf.mxu2  ;;  %v667_v42 = vand.u32 2147483648, %v593_v52  ;;  %v665_v19 = vand.u32 2147483647, %v593_v52  ;;  %vm661_vm2 = vweird.f32 %v593_v52 }
 0x20e   :  { %v1824_v27 = vadd.f32 %v1640_v59, %v427_v57  ;;  %1340 = vpow2.f32 %v554_v55 }
 0x20f   :  { %1342 = vpow2.f32 %v558_v3  ;;  %v668_v49 = vor.u32 1.1754944e-38, %v667_v42  ;;  %vm666_vm4 = vcmp.eq.f32.partialorder %v665_v19, 8.507059e+37 }
 0x210   :  { %492 = vmax.xlane.f32.xlu0 %v1824_v27  ;;  %616 = vadd.xlane.f32.xlu2 %v1826_v58 }
 0x213   :  { %v1339_v9 = vpop.eup %1338  ;;  %v465_v20 = vpop.xlane.xlu1 %464 }
 0x214   :  { %v657_v1 = vmul.f32 %v1339_v9, %v593_v52  ;;  %v512_v32 = vsub.f32 %v1726_v0, %v465_v20  ;;  %v595_v2 = vpop.xlane.xlu0 %594  ;;  %v1835_v17 = vpop.eup %1340  ;;  %vm662_vm1 = vweird.f32 %v1339_v9  ;;  %v510_v0 = vsub.f32 %v1713_v14, %v461_v39 }
 0x215   :  { %1344 = vrcp.f32 %v595_v2  ;;  %v429_v8 = vpop.f32.mrf.mxu2  ;;  %v1837_v61 = vpop.eup %1342  ;;  %vm663_vm3 = vmor %vm661_vm2, %vm662_vm1  ;;  %v682_v16 = vand.u32 2147483648, %v595_v2  ;;  %v680_v51 = vand.u32 2147483647, %v595_v2  ;;  %vm676_vm6 = vweird.f32 %v595_v2 }
 0x216   :  { %v658_v37 = vsub.f32 1.0, %v657_v1  ;;  %v560_v11 = vmul.f32 1.442695, %v512_v32  ;;  %v1833_v13 = vadd.f32 %v1640_v59, %v429_v8  ;;  %v556_v35 = vmul.f32 1.442695, %v510_v0 }
 0x217   :  { %v683_v55 = vor.u32 1.1754944e-38, %v682_v16  ;;  %vm681_vm8 = vcmp.eq.f32.partialorder %v680_v51, 8.507059e+37 }
 0x218   :  { %v659_v44 = vmul.f32 %v1339_v9, %v658_v37  ;;  %1346 = vpow2.f32 %v560_v11  ;;  %494 = vmax.xlane.f32.xlu1 %v1833_v13  ;;  %618 = vadd.xlane.f32.xlu0 %v1835_v17 }
 0x219   :  { %1348 = vpow2.f32 %v550_v5  ;;  %622 = vadd.xlane.f32.xlu2 %v1837_v61 }
 0x21a   :  { %v660_v59 = vadd.f32 %v1339_v9, %v659_v44 }
 0x21b   :  { %v1345_v23 = vpop.eup %1344  ;;  %v467_v28 = vpop.xlane.xlu2 %466 }
 0x21c   :  { %v664_v29 = vsel %vm663_vm3, %v1339_v9, %v660_v59  ;;  %v672_v6 = vmul.f32 %v1345_v23, %v595_v2  ;;  %v597_v33 = vpop.xlane.xlu1 %596  ;;  %vm677_vm5 = vweird.f32 %v1345_v23  ;;  %v513_v21 = vsub.f32 %v1734_v34, %v467_v28 }
 0x21d   :  { %v669_v10 = vsel %vm666_vm4, %v668_v49, %v664_v29  ;;  %1350 = vrcp.f32 %v597_v33  ;;  %vm678_vm7 = vmor %vm676_vm6, %vm677_vm5  ;;  %v697_v2 = vand.u32 2147483648, %v597_v33  ;;  %v695_v42 = vand.u32 2147483647, %v597_v33 }
 0x21e   :  { %v1843_v41 = vpop.eup %1346  ;;  %v670_v45 = vmul.f32 %v1722_v24, %v669_v10  ;;  %v673_v14 = vsub.f32 1.0, %v672_v6  ;;  %1352 = vpow2.f32 %v556_v35  ;;  %v562_v32 = vmul.f32 1.442695, %v513_v21 }
 0x21f   :  { %v1846_v39 = vpop.eup %1348  ;;  %vm691_vm10 = vweird.f32 %v597_v33  ;;  %vm696_vm12 = vcmp.eq.f32.partialorder %v695_v42, 8.507059e+37 }
 0x220   :  { %1136 = vst [vmem:[%s2059_s5] sm:$0xff] %v670_v45  ;;  %v674_v48 = vmul.f32 %v1345_v23, %v673_v14  ;;  %614 = vadd.xlane.f32.xlu1 %v1846_v39  ;;  %624 = vadd.xlane.f32.xlu0 %v1843_v41 }
 0x222   :  { %v675_v52 = vadd.f32 %v1345_v23, %v674_v48 }
 0x223   :  { %v1351_v24 = vpop.eup %1350  ;;  %v469_v57 = vpop.xlane.xlu0 %468 }
 0x224   :  { %v679_v3 = vsel %vm678_vm7, %v1345_v23, %v675_v52  ;;  %v687_v62 = vmul.f32 %v1351_v24, %v597_v33  ;;  %v514_v9 = vsub.f32 %v1742_v40, %v469_v57  ;;  %v599_v20 = vpop.xlane.xlu2 %598  ;;  %v1856_v34 = vpop.eup %1352  ;;  %vm692_vm9 = vweird.f32 %v1351_v24 }
 0x225   :  { %v684_v1 = vsel %vm681_vm8, %v683_v55, %v679_v3  ;;  %1354 = vrcp.f32 %v599_v20  ;;  %vm693_vm11 = vmor %vm691_vm10, %vm692_vm9  ;;  %v712_v33 = vand.u32 2147483648, %v599_v20  ;;  %vm706_vm14 = vweird.f32 %v599_v20 }
 0x226   :  { %v685_v5 = vmul.f32 %v1729_v30, %v684_v1  ;;  %v688_v8 = vsub.f32 1.0, %v687_v62  ;;  %v564_v37 = vmul.f32 1.442695, %v514_v9  ;;  %v698_v30 = vor.u32 1.1754944e-38, %v697_v2 }
 0x227   :  { %v713_v48 = vor.u32 1.1754944e-38, %v712_v33 }
 0x228   :  { %1137 = vst [vmem:[%s2059_s5 + $0x8] sm:$0xff] %v685_v5  ;;  %v689_v11 = vmul.f32 %v1351_v24, %v688_v8  ;;  %1356 = vpow2.f32 %v564_v37  ;;  %620 = vadd.xlane.f32.xlu1 %v1856_v34 }
 0x229   :  { %1358 = vpow2.f32 %v562_v32 }
 0x22a   :  { %v690_v40 = vadd.f32 %v1351_v24, %v689_v11 }
 0x22b   :  { %v1355_v44 = vpop.eup %1354  ;;  %v471_v19 = vpop.xlane.xlu1 %470 }
 0x22c   :  { %v694_v0 = vsel %vm693_vm11, %v1351_v24, %v690_v40  ;;  %v702_v59 = vmul.f32 %v1355_v44, %v599_v20  ;;  %v515_v23 = vsub.f32 %v1750_v47, %v471_v19  ;;  %v601_v49 = vpop.xlane.xlu0 %600  ;;  %vm707_vm13 = vweird.f32 %v1355_v44 }
 0x22d   :  { %v699_v28 = vsel %vm696_vm12, %v698_v30, %v694_v0  ;;  %1360 = vrcp.f32 %v601_v49  ;;  %v710_v47 = vand.u32 2147483647, %v599_v20  ;;  %vm708_vm15 = vmor %vm706_vm14, %vm707_vm13  ;;  %v727_v32 = vand.u32 2147483648, %v601_v49 }
 0x22e   :  { %v1863_v29 = vpop.eup %1356  ;;  %v700_v6 = vmul.f32 %v1737_v36, %v699_v28  ;;  %v703_v35 = vsub.f32 1.0, %v702_v59  ;;  %v566_v10 = vmul.f32 1.442695, %v515_v23  ;;  %v725_v5 = vand.u32 2147483647, %v601_v49 }
 0x22f   :  { %v1866_v45 = vpop.eup %1358  ;;  %628 = vadd.xlane.f32.xlu2 %v1863_v29  ;;  %vm711_vm0 = vcmp.eq.f32.partialorder %v710_v47, 8.507059e+37  ;;  %vm721_vm2 = vweird.f32 %v601_v49  ;;  %v728_v37 = vor.u32 1.1754944e-38, %v727_v32 }
 0x230   :  { %1138 = vst [vmem:[%s2059_s5 + $0x10] sm:$0xff] %v700_v6  ;;  %v704_v14 = vmul.f32 %v1355_v44, %v703_v35  ;;  %1362 = vpow2.f32 %v566_v10  ;;  %626 = vadd.xlane.f32.xlu1 %v1866_v45  ;;  %vm726_vm4 = vcmp.eq.f32.partialorder %v725_v5, 8.507059e+37 }
 0x232   :  { %v705_v16 = vadd.f32 %v1355_v44, %v704_v14 }
 0x233   :  { %v1361_v36 = vpop.eup %1360  ;;  %v473_v51 = vpop.xlane.xlu2 %472 }
 0x234   :  { %v709_v21 = vsel %vm708_vm15, %v1355_v44, %v705_v16  ;;  %v717_v52 = vmul.f32 %v1361_v36, %v601_v49  ;;  %v516_v24 = vsub.f32 %v1758_v53, %v473_v51  ;;  %v603_v55 = vpop.xlane.xlu1 %602  ;;  %vm722_vm1 = vweird.f32 %v1361_v36 }
 0x235   :  { %v714_v57 = vsel %vm711_vm0, %v713_v48, %v709_v21  ;;  %1364 = vrcp.f32 %v603_v55  ;;  %vm723_vm3 = vmor %vm721_vm2, %vm722_vm1  ;;  %v742_v23 = vand.u32 2147483648, %v603_v55  ;;  %v740_v28 = vand.u32 2147483647, %v603_v55 }
 0x236   :  { %v1874_v3 = vpop.eup %1362  ;;  %v715_v62 = vmul.f32 %v1745_v43, %v714_v57  ;;  %v718_v9 = vsub.f32 1.0, %v717_v52  ;;  %v568_v1 = vmul.f32 1.442695, %v516_v24  ;;  %vm736_vm6 = vweird.f32 %v603_v55 }
 0x237   :  { %630 = vadd.xlane.f32.xlu0 %v1874_v3  ;;  %v743_v35 = vor.u32 1.1754944e-38, %v742_v23  ;;  %vm741_vm8 = vcmp.eq.f32.partialorder %v740_v28, 8.507059e+37 }
 0x238   :  { %1139 = vst [vmem:[%s2059_s5 + $0x18] sm:$0xff] %v715_v62  ;;  %v719_v20 = vmul.f32 %v1361_v36, %v718_v9  ;;  %1366 = vpow2.f32 %v568_v1 }
 0x23a   :  { %v720_v53 = vadd.f32 %v1361_v36, %v719_v20 }
 0x23b   :  { %v1365_v8 = vpop.eup %1364  ;;  %v475_v2 = vpop.xlane.xlu0 %474 }
 0x23c   :  { %v724_v43 = vsel %vm723_vm3, %v1361_v36, %v720_v53  ;;  %v732_v11 = vmul.f32 %v1365_v8, %v603_v55  ;;  %v517_v42 = vsub.f32 %v1766_v60, %v475_v2  ;;  %v605_v40 = vpop.xlane.xlu2 %604  ;;  %vm737_vm5 = vweird.f32 %v1365_v8 }
 0x23d   :  { %v729_v44 = vsel %vm726_vm4, %v728_v37, %v724_v43  ;;  %1368 = vrcp.f32 %v605_v40  ;;  %vm738_vm7 = vmor %vm736_vm6, %vm737_vm5  ;;  %v757_v52 = vand.u32 2147483648, %v605_v40  ;;  %v755_v55 = vand.u32 2147483647, %v605_v40 }
 0x23e   :  { %v1882_v30 = vpop.eup %1366  ;;  %v730_v19 = vmul.f32 %v1753_v50, %v729_v44  ;;  %v733_v0 = vsub.f32 1.0, %v732_v11  ;;  %v570_v59 = vmul.f32 1.442695, %v517_v42  ;;  %vm751_vm10 = vweird.f32 %v605_v40 }
 0x23f   :  { %632 = vadd.xlane.f32.xlu1 %v1882_v30  ;;  %v758_v62 = vor.u32 1.1754944e-38, %v757_v52  ;;  %vm756_vm12 = vcmp.eq.f32.partialorder %v755_v55, 8.507059e+37 }
 0x240   :  { %1140 = vst [vmem:[%s2059_s5 + $0x20] sm:$0xff] %v730_v19  ;;  %v734_v49 = vmul.f32 %v1365_v8, %v733_v0  ;;  %1370 = vpow2.f32 %v570_v59 }
 0x242   :  { %v735_v60 = vadd.f32 %v1365_v8, %v734_v49 }
 0x243   :  { %v1369_v6 = vpop.eup %1368  ;;  %v477_v10 = vpop.xlane.xlu1 %476 }
 0x244   :  { %v739_v50 = vsel %vm738_vm7, %v1365_v8, %v735_v60  ;;  %v747_v33 = vmul.f32 %v1369_v6, %v605_v40  ;;  %v518_v14 = vsub.f32 %v1774_v4, %v477_v10  ;;  %v607_v47 = vpop.xlane.xlu0 %606  ;;  %vm752_vm9 = vweird.f32 %v1369_v6 }
 0x245   :  { %v744_v16 = vsel %vm741_vm8, %v743_v35, %v739_v50  ;;  %1372 = vrcp.f32 %v607_v47  ;;  %vm753_vm11 = vmor %vm751_vm10, %vm752_vm9  ;;  %v772_v43 = vand.u32 2147483648, %v607_v47  ;;  %v770_v42 = vand.u32 2147483647, %v607_v47 }
 0x246   :  { %v1890_v36 = vpop.eup %1370  ;;  %v745_v48 = vmul.f32 %v1761_v56, %v744_v16  ;;  %v748_v51 = vsub.f32 1.0, %v747_v33  ;;  %v572_v21 = vmul.f32 1.442695, %v518_v14  ;;  %vm766_vm14 = vweird.f32 %v607_v47 }
 0x247   :  { %634 = vadd.xlane.f32.xlu2 %v1890_v36  ;;  %v773_v44 = vor.u32 1.1754944e-38, %v772_v43  ;;  %vm771_vm0 = vcmp.eq.f32.partialorder %v770_v42, 8.507059e+37 }
 0x248   :  { %1141 = vst [vmem:[%s2059_s5 + $0x28] sm:$0xff] %v745_v48  ;;  %v749_v24 = vmul.f32 %v1369_v6, %v748_v51  ;;  %1374 = vpow2.f32 %v572_v21 }
 0x24a   :  { %v750_v4 = vadd.f32 %v1369_v6, %v749_v24 }
 0x24b   :  { %v1373_v57 = vpop.eup %1372  ;;  %v479_v9 = vpop.xlane.xlu2 %478 }
 0x24c   :  { %v754_v56 = vsel %vm753_vm11, %v1369_v6, %v750_v4  ;;  %v762_v1 = vmul.f32 %v1373_v57, %v607_v47  ;;  %v519_v32 = vsub.f32 %v1782_v12, %v479_v9  ;;  %v609_v20 = vpop.xlane.xlu1 %608  ;;  %vm767_vm13 = vweird.f32 %v1373_v57 }
 0x24d   :  { %v759_v5 = vsel %vm756_vm12, %v758_v62, %v754_v56  ;;  %1376 = vrcp.f32 %v609_v20  ;;  %vm768_vm15 = vmor %vm766_vm14, %vm767_vm13  ;;  %v787_v10 = vand.u32 2147483648, %v609_v20  ;;  %v785_v33 = vand.u32 2147483647, %v609_v20 }
 0x24e   :  { %v1898_v53 = vpop.eup %1374  ;;  %v760_v8 = vmul.f32 %v1769_v63, %v759_v5  ;;  %v763_v37 = vsub.f32 1.0, %v762_v1  ;;  %v574_v2 = vmul.f32 1.442695, %v519_v32  ;;  %vm781_vm2 = vweird.f32 %v609_v20 }
 0x24f   :  { %636 = vadd.xlane.f32.xlu0 %v1898_v53  ;;  %v788_v47 = vor.u32 1.1754944e-38, %v787_v10  ;;  %vm786_vm4 = vcmp.eq.f32.partialorder %v785_v33, 8.507059e+37 }
 0x250   :  { %1142 = vst [vmem:[%s2059_s5 + $0x30] sm:$0xff] %v760_v8  ;;  %v764_v11 = vmul.f32 %v1373_v57, %v763_v37  ;;  %1378 = vpow2.f32 %v574_v2 }
 0x252   :  { %v765_v12 = vadd.f32 %v1373_v57, %v764_v11 }
 0x253   :  { %v1377_v40 = vpop.eup %1376  ;;  %v481_v19 = vpop.xlane.xlu0 %480 }
 0x254   :  { %v769_v63 = vsel %vm768_vm15, %v1373_v57, %v765_v12  ;;  %v777_v0 = vmul.f32 %v1377_v40, %v609_v20  ;;  %v520_v59 = vsub.f32 %v1790_v18, %v481_v19  ;;  %v611_v23 = vpop.xlane.xlu2 %610  ;;  %vm782_vm1 = vweird.f32 %v1377_v40 }
 0x255   :  { %v774_v49 = vsel %vm771_vm0, %v773_v44, %v769_v63  ;;  %1380 = vrcp.f32 %v611_v23  ;;  %vm783_vm3 = vmor %vm781_vm2, %vm782_vm1  ;;  %v802_v62 = vand.u32 2147483648, %v611_v23  ;;  %v800_v56 = vand.u32 2147483647, %v611_v23 }
 0x256   :  { %v1906_v28 = vpop.eup %1378  ;;  %v775_v60 = vmul.f32 %v1777_v7, %v774_v49  ;;  %v778_v6 = vsub.f32 1.0, %v777_v0  ;;  %v576_v35 = vmul.f32 1.442695, %v520_v59  ;;  %vm796_vm6 = vweird.f32 %v611_v23 }
 0x257   :  { %638 = vadd.xlane.f32.xlu1 %v1906_v28  ;;  %v803_v32 = vor.u32 1.1754944e-38, %v802_v62  ;;  %vm801_vm8 = vcmp.eq.f32.partialorder %v800_v56, 8.507059e+37 }
 0x258   :  { %1143 = vst [vmem:[%s2059_s5 + $0x38] sm:$0xff] %v775_v60  ;;  %v779_v50 = vmul.f32 %v1377_v40, %v778_v6  ;;  %1382 = vpow2.f32 %v576_v35 }
 0x25a   :  { %v780_v18 = vadd.f32 %v1377_v40, %v779_v50 }
 0x25b   :  { %v1381_v14 = vpop.eup %1380  ;;  %v483_v16 = vpop.xlane.xlu1 %482 }
 0x25c   :  { %v784_v7 = vsel %vm783_vm3, %v1377_v40, %v780_v18  ;;  %v792_v48 = vmul.f32 %v1381_v14, %v611_v23  ;;  %v521_v51 = vsub.f32 %v1798_v25, %v483_v16  ;;  %v613_v21 = vpop.xlane.xlu0 %612  ;;  %vm797_vm5 = vweird.f32 %v1381_v14 }
 0x25d   :  { %v789_v52 = vsel %vm786_vm4, %v788_v47, %v784_v7  ;;  %1384 = vrcp.f32 %v613_v21  ;;  %vm798_vm7 = vmor %vm796_vm6, %vm797_vm5  ;;  %v817_v12 = vand.u32 2147483648, %v613_v21  ;;  %v815_v44 = vand.u32 2147483647, %v613_v21 }
 0x25e   :  { %v1914_v24 = vpop.eup %1382  ;;  %v790_v55 = vmul.f32 %v1785_v15, %v789_v52  ;;  %v793_v4 = vsub.f32 1.0, %v792_v48  ;;  %v578_v57 = vmul.f32 1.442695, %v521_v51  ;;  %vm811_vm10 = vweird.f32 %v613_v21 }
 0x25f   :  { %640 = vadd.xlane.f32.xlu2 %v1914_v24  ;;  %vm816_vm12 = vcmp.eq.f32.partialorder %v815_v44, 8.507059e+37 }
 0x260   :  { %1144 = vst [vmem:[%s2059_s5 + $0x40] sm:$0xff] %v790_v55  ;;  %v794_v9 = vmul.f32 %v1381_v14, %v793_v4  ;;  %1386 = vpow2.f32 %v578_v57 }
 0x262   :  { %v795_v25 = vadd.f32 %v1381_v14, %v794_v9 }
 0x263   :  { %v1385_v1 = vpop.eup %1384  ;;  %v485_v20 = vpop.xlane.xlu2 %484 }
 0x264   :  { %v799_v15 = vsel %vm798_vm7, %v1381_v14, %v795_v25  ;;  %v807_v5 = vmul.f32 %v1385_v1, %v613_v21  ;;  %v522_v8 = vsub.f32 %v1805_v54, %v485_v20  ;;  %vm812_vm9 = vweird.f32 %v1385_v1 }
 0x265   :  { %v804_v37 = vsel %vm801_vm8, %v803_v32, %v799_v15  ;;  %vm813_vm11 = vmor %vm811_vm10, %vm812_vm9  ;;  %v818_v54 = vor.u32 1.1754944e-38, %v817_v12 }
 0x266   :  { %v1922_v2 = vpop.eup %1386  ;;  %v805_v43 = vmul.f32 %v1793_v22, %v804_v37  ;;  %v808_v11 = vsub.f32 1.0, %v807_v5  ;;  %v580_v42 = vmul.f32 1.442695, %v522_v8 }
 0x267   :  { %642 = vadd.xlane.f32.xlu0 %v1922_v2 }
 0x268   :  { %1145 = vst [vmem:[%s2059_s5 + $0x48] sm:$0xff] %v805_v43  ;;  %v809_v40 = vmul.f32 %v1385_v1, %v808_v11  ;;  %1388 = vpow2.f32 %v580_v42 }
 0x26a   :  { %v810_v19 = vadd.f32 %v1385_v1, %v809_v40 }
 0x26b   :  { %v487_v63 = vpop.xlane.xlu0 %486 }
 0x26c   :  { %v814_v0 = vsel %vm813_vm11, %v1385_v1, %v810_v19  ;;  %v523_v22 = vsub.f32 %v1809_v31, %v487_v63 }
 0x26d   :  { %v819_v59 = vsel %vm816_vm12, %v818_v54, %v814_v0 }
 0x26e   :  { %v1930_v23 = vpop.eup %1388  ;;  %v820_v49 = vmul.f32 %v1800_v26, %v819_v59  ;;  %v582_v60 = vmul.f32 1.442695, %v523_v22 }
 0x26f   :  { %644 = vadd.xlane.f32.xlu1 %v1930_v23 }
 0x270   :  { %1146 = vst [vmem:[%s2059_s5 + $0x50] sm:$0xff] %v820_v49  ;;  %1390 = vpow2.f32 %v582_v60 }
 0x273   :  { %v489_v6 = vpop.xlane.xlu1 %488 }
 0x274   :  { %v524_v35 = vsub.f32 %v1813_v38, %v489_v6 }
 0x276   :  { %v1938_v10 = vpop.eup %1390  ;;  %v584_v50 = vmul.f32 1.442695, %v524_v35 }
 0x277   :  { %646 = vadd.xlane.f32.xlu2 %v1938_v10 }
 0x278   :  { %1392 = vpow2.f32 %v584_v50 }
 0x27b   :  { %v491_v31 = vpop.xlane.xlu2 %490 }
 0x27c   :  { %v525_v26 = vsub.f32 %v1818_v46, %v491_v31 }
 0x27e   :  { %v1942_v33 = vpop.eup %1392  ;;  %v586_v18 = vmul.f32 1.442695, %v525_v26 }
 0x27f   :  { %648 = vadd.xlane.f32.xlu0 %v1942_v33 }
 0x280   :  { %1394 = vpow2.f32 %v586_v18 }
 0x283   :  { %v617_v14 = vpop.xlane.xlu2 %616  ;;  %v493_v47 = vpop.xlane.xlu0 %492 }
 0x284   :  { %1396 = vrcp.f32 %v617_v14  ;;  %v526_v38 = vsub.f32 %v1824_v27, %v493_v47  ;;  %v847_v57 = vand.u32 2147483648, %v617_v14  ;;  %v845_v56 = vand.u32 2147483647, %v617_v14 }
 0x285   :  { %vm841_vm14 = vweird.f32 %v617_v14 }
 0x286   :  { %v1946_v16 = vpop.eup %1394  ;;  %v588_v7 = vmul.f32 1.442695, %v526_v38  ;;  %v848_v32 = vor.u32 1.1754944e-38, %v847_v57  ;;  %vm846_vm0 = vcmp.eq.f32.partialorder %v845_v56, 8.507059e+37 }
 0x287   :  { %650 = vadd.xlane.f32.xlu1 %v1946_v16 }
 0x288   :  { %1398 = vpow2.f32 %v588_v7 }
 0x28a   :  { %v1397_v48 = vpop.eup %1396 }
 0x28b   :  { %v837_v51 = vmul.f32 %v1397_v48, %v617_v14  ;;  %v495_v46 = vpop.xlane.xlu1 %494  ;;  %v619_v21 = vpop.xlane.xlu0 %618  ;;  %vm842_vm13 = vweird.f32 %v1397_v48 }
 0x28c   :  { %v527_v52 = vsub.f32 %v1833_v13, %v495_v46  ;;  %v623_v55 = vpop.xlane.xlu2 %622  ;;  %1400 = vrcp.f32 %v619_v21  ;;  %vm843_vm15 = vmor %vm841_vm14, %vm842_vm13  ;;  %v862_v44 = vand.u32 2147483648, %v619_v21  ;;  %v860_v63 = vand.u32 2147483647, %v619_v21 }
 0x28d   :  { %v838_v4 = vsub.f32 1.0, %v837_v51  ;;  %1402 = vrcp.f32 %v623_v55  ;;  %v892_v19 = vand.u32 2147483648, %v623_v55  ;;  %vm856_vm3 = vweird.f32 %v619_v21 }
 0x28e   :  { %v590_v62 = vmul.f32 1.442695, %v527_v52  ;;  %v1950_v9 = vpop.eup %1398  ;;  %vm886_vm4 = vweird.f32 %v623_v55  ;;  %v863_v60 = vor.u32 1.1754944e-38, %v862_v44  ;;  %vm861_vm7 = vcmp.eq.f32.partialorder %v860_v63, 8.507059e+37 }
 0x28f   :  { %v839_v27 = vmul.f32 %v1397_v48, %v838_v4  ;;  %652 = vadd.xlane.f32.xlu2 %v1950_v9  ;;  %v893_v6 = vor.u32 1.1754944e-38, %v892_v19 }
 0x290   :  { %1404 = vpow2.f32 %v590_v62 }
 0x291   :  { %v840_v25 = vadd.f32 %v1397_v48, %v839_v27 }
 0x292   :  { %v1401_v1 = vpop.eup %1400 }
 0x293   :  { %v1403_v13 = vpop.eup %1402  ;;  %v844_v20 = vsel %vm843_vm15, %v1397_v48, %v840_v25  ;;  %v852_v15 = vmul.f32 %v1401_v1, %v619_v21  ;;  %v1953_v5 = vpop.xlane.xlu1 %614  ;;  %vm857_vm1 = vweird.f32 %v1401_v1 }
 0x294   :  { %v1955_v8 = vpop.xlane.xlu0 %624  ;;  %v849_v37 = vsel %vm846_vm0, %v848_v32, %v844_v20  ;;  %v882_v43 = vmul.f32 %v1403_v13, %v623_v55  ;;  %1406 = vrcp.f32 %v1953_v5  ;;  %vm887_vm2 = vweird.f32 %v1403_v13  ;;  %vm858_vm5 = vmor %vm856_vm3, %vm857_vm1 }
 0x295   :  { %v850_v11 = vmul.f32 %v1826_v58, %v849_v37  ;;  %v853_v42 = vsub.f32 1.0, %v852_v15  ;;  %1408 = vrcp.f32 %v1955_v8  ;;  %v890_v58 = vand.u32 2147483647, %v623_v55  ;;  %vm888_vm6 = vmor %vm886_vm4, %vm887_vm2 }
 0x296   :  { %v1959_v12 = vpop.eup %1404  ;;  %v883_v40 = vsub.f32 1.0, %v882_v43  ;;  %v832_v46 = vand.u32 2147483648, %v1953_v5  ;;  %v830_v52 = vand.u32 2147483647, %v1953_v5  ;;  %vm826_vm10 = vweird.f32 %v1953_v5 }
 0x297   :  { %1148 = vst [vmem:[%s2059_s5 + $0x60] sm:$0xff] %v850_v11  ;;  %v854_v54 = vmul.f32 %v1401_v1, %v853_v42  ;;  %654 = vadd.xlane.f32.xlu0 %v1959_v12  ;;  %vm891_vm8 = vcmp.eq.f32.partialorder %v890_v58, 8.507059e+37  ;;  %v905_v57 = vand.u32 2147483647, %v1955_v8  ;;  %vm901_vm13 = vweird.f32 %v1955_v8 }
 0x298   :  { %v884_v0 = vmul.f32 %v1403_v13, %v883_v40  ;;  %v833_v27 = vor.u32 1.1754944e-38, %v832_v46  ;;  %vm831_vm14 = vcmp.eq.f32.partialorder %v830_v52, 8.507059e+37 }
 0x299   :  { %v855_v22 = vadd.f32 %v1401_v1, %v854_v54  ;;  %vm906_vm0 = vcmp.eq.f32.partialorder %v905_v57, 8.507059e+37 }
 0x29a   :  { %v1407_v59 = vpop.eup %1406  ;;  %v885_v49 = vadd.f32 %v1403_v13, %v884_v0 }
 0x29b   :  { %v859_v35 = vsel %vm858_vm5, %v1401_v1, %v855_v22  ;;  %v822_v50 = vmul.f32 %v1407_v59, %v1953_v5  ;;  %v621_v31 = vpop.xlane.xlu1 %620  ;;  %v1409_v26 = vpop.eup %1408  ;;  %vm827_vm9 = vweird.f32 %v1407_v59 }
 0x29c   :  { %v889_v18 = vsel %vm888_vm6, %v1403_v13, %v885_v49  ;;  %v864_v14 = vsel %vm861_vm7, %v863_v60, %v859_v35  ;;  %1410 = vrcp.f32 %v621_v31  ;;  %v897_v48 = vmul.f32 %v1409_v26, %v1955_v8  ;;  %vm828_vm12 = vmor %vm826_vm10, %vm827_vm9 }
 0x29d   :  { %v894_v47 = vsel %vm891_vm8, %v893_v6, %v889_v18  ;;  %v865_v38 = vmul.f32 %v1835_v17, %v864_v14  ;;  %v823_v7 = vsub.f32 1.0, %v822_v50  ;;  %v907_v17 = vand.u32 2147483648, %v1955_v8 }
 0x29e   :  { %v895_v51 = vmul.f32 %v1837_v61, %v894_v47  ;;  %v898_v55 = vsub.f32 1.0, %v897_v48  ;;  %vm902_vm11 = vweird.f32 %v1409_v26  ;;  %v877_v42 = vand.u32 2147483648, %v621_v31 }
 0x29f   :  { %1149 = vst [vmem:[%s2059_s5 + $0x68] sm:$0xff] %v865_v38  ;;  %v824_v21 = vmul.f32 %v1407_v59, %v823_v7  ;;  %vm903_vm15 = vmor %vm901_vm13, %vm902_vm11  ;;  %v908_v15 = vor.u32 1.1754944e-38, %v907_v17  ;;  %v875_v44 = vand.u32 2147483647, %v621_v31  ;;  %vm871_vm2 = vweird.f32 %v621_v31 }
 0x2a0   :  { %1151 = vst [vmem:[%s2059_s5 + $0x78] sm:$0xff] %v895_v51  ;;  %v899_v4 = vmul.f32 %v1409_v26, %v898_v55  ;;  %v878_v54 = vor.u32 1.1754944e-38, %v877_v42 }
 0x2a1   :  { %v825_v61 = vadd.f32 %v1407_v59, %v824_v21  ;;  %vm876_vm4 = vcmp.eq.f32.partialorder %v875_v44, 8.507059e+37 }
 0x2a2   :  { %v1411_v62 = vpop.eup %1410  ;;  %v629_v56 = vpop.xlane.xlu2 %628  ;;  %v900_v1 = vadd.f32 %v1409_v26, %v899_v4 }
 0x2a3   :  { %v829_v25 = vsel %vm828_vm12, %v1407_v59, %v825_v61  ;;  %v867_v32 = vmul.f32 %v1411_v62, %v621_v31  ;;  %v627_v13 = vpop.xlane.xlu1 %626  ;;  %1412 = vrcp.f32 %v629_v56  ;;  %vm872_vm1 = vweird.f32 %v1411_v62 }
 0x2a4   :  { %v834_v20 = vsel %vm831_vm14, %v833_v27, %v829_v25  ;;  %v904_v37 = vsel %vm903_vm15, %v1409_v26, %v900_v1  ;;  %1414 = vrcp.f32 %v627_v13  ;;  %vm873_vm3 = vmor %vm871_vm2, %vm872_vm1  ;;  %v935_v6 = vand.u32 2147483647, %v629_v56 }
 0x2a5   :  { %v835_v5 = vmul.f32 %v1846_v39, %v834_v20  ;;  %v868_v43 = vsub.f32 1.0, %v867_v32  ;;  %v909_v11 = vsel %vm906_vm0, %v908_v15, %v904_v37  ;;  %v937_v35 = vand.u32 2147483648, %v629_v56 }
 0x2a6   :  { %v910_v8 = vmul.f32 %v1843_v41, %v909_v11  ;;  %vm931_vm6 = vweird.f32 %v629_v56  ;;  %v922_v26 = vand.u32 2147483648, %v627_v13  ;;  %v920_v38 = vand.u32 2147483647, %v627_v13 }
 0x2a7   :  { %1147 = vst [vmem:[%s2059_s5 + $0x58] sm:$0xff] %v835_v5  ;;  %v869_v40 = vmul.f32 %v1411_v62, %v868_v43  ;;  %vm936_vm9 = vcmp.eq.f32.partialorder %v935_v6, 8.507059e+37  ;;  %vm916_vm10 = vweird.f32 %v627_v13 }
 0x2a8   :  { %1152 = vst [vmem:[%s2059_s5 + $0x80] sm:$0xff] %v910_v8  ;;  %v923_v52 = vor.u32 1.1754944e-38, %v922_v26  ;;  %vm921_vm12 = vcmp.eq.f32.partialorder %v920_v38, 8.507059e+37 }
 0x2a9   :  { %v870_v39 = vadd.f32 %v1411_v62, %v869_v40  ;;  %v1413_v19 = vpop.eup %1412 }
 0x2aa   :  { %v631_v63 = vpop.xlane.xlu0 %630  ;;  %v927_v58 = vmul.f32 %v1413_v19, %v629_v56  ;;  %v1415_v22 = vpop.eup %1414  ;;  %vm932_vm5 = vweird.f32 %v1413_v19 }
 0x2ab   :  { %v874_v0 = vsel %vm873_vm3, %v1411_v62, %v870_v39  ;;  %1416 = vrcp.f32 %v631_v63  ;;  %v912_v60 = vmul.f32 %v1415_v22, %v627_v13  ;;  %vm917_vm7 = vweird.f32 %v1415_v22  ;;  %vm933_vm8 = vmor %vm931_vm6, %vm932_vm5 }
 0x2ac   :  { %v879_v59 = vsel %vm876_vm4, %v878_v54, %v874_v0  ;;  %v928_v49 = vsub.f32 1.0, %v927_v58  ;;  %vm918_vm11 = vmor %vm916_vm10, %vm917_vm7  ;;  %v952_v4 = vand.u32 2147483648, %v631_v63  ;;  %v950_v27 = vand.u32 2147483647, %v631_v63 }
 0x2ad   :  { %v880_v41 = vmul.f32 %v1856_v34, %v879_v59  ;;  %v913_v31 = vsub.f32 1.0, %v912_v60  ;;  %v938_v34 = vor.u32 1.1754944e-38, %v937_v35  ;;  %vm946_vm14 = vweird.f32 %v631_v63 }
 0x2ae   :  { %v929_v50 = vmul.f32 %v1413_v19, %v928_v49  ;;  %vm951_vm0 = vcmp.eq.f32.partialorder %v950_v27, 8.507059e+37 }
 0x2af   :  { %1150 = vst [vmem:[%s2059_s5 + $0x70] sm:$0xff] %v880_v41  ;;  %v914_v47 = vmul.f32 %v1415_v22, %v913_v31 }
 0x2b0   :  { %v930_v14 = vadd.f32 %v1413_v19, %v929_v50 }
 0x2b1   :  { %v1417_v18 = vpop.eup %1416  ;;  %v915_v46 = vadd.f32 %v1415_v22, %v914_v47 }
 0x2b2   :  { %v942_v7 = vmul.f32 %v1417_v18, %v631_v63  ;;  %v633_v48 = vpop.xlane.xlu1 %632  ;;  %v934_v51 = vsel %vm933_vm8, %v1413_v19, %v930_v14  ;;  %vm947_vm13 = vweird.f32 %v1417_v18 }
 0x2b3   :  { %1418 = vrcp.f32 %v633_v48  ;;  %v939_v21 = vsel %vm936_vm9, %v938_v34, %v934_v51  ;;  %v919_v61 = vsel %vm918_vm11, %v1415_v22, %v915_v46  ;;  %vm948_vm15 = vmor %vm946_vm14, %vm947_vm13  ;;  %v967_v43 = vand.u32 2147483648, %v633_v48 }
 0x2b4   :  { %v943_v55 = vsub.f32 1.0, %v942_v7  ;;  %v940_v17 = vmul.f32 %v1863_v29, %v939_v21  ;;  %v924_v57 = vsel %vm921_vm12, %v923_v52, %v919_v61  ;;  %v953_v29 = vor.u32 1.1754944e-38, %v952_v4 }
 0x2b5   :  { %v925_v56 = vmul.f32 %v1866_v45, %v924_v57  ;;  %v965_v11 = vand.u32 2147483647, %v633_v48  ;;  %vm961_vm2 = vweird.f32 %v633_v48  ;;  %v968_v40 = vor.u32 1.1754944e-38, %v967_v43 }
 0x2b6   :  { %v944_v62 = vmul.f32 %v1417_v18, %v943_v55  ;;  %1154 = vst [vmem:[%s2059_s5 + $0x90] sm:$0xff] %v940_v17 }
 0x2b7   :  { %1153 = vst [vmem:[%s2059_s5 + $0x88] sm:$0xff] %v925_v56  ;;  %vm966_vm4 = vcmp.eq.f32.partialorder %v965_v11, 8.507059e+37 }
 0x2b8   :  { %v945_v25 = vadd.f32 %v1417_v18, %v944_v62 }
 0x2b9   :  { %v1419_v1 = vpop.eup %1418 }
 0x2ba   :  { %v949_v32 = vsel %vm948_vm15, %v1417_v18, %v945_v25  ;;  %v957_v13 = vmul.f32 %v1419_v1, %v633_v48  ;;  %v635_v20 = vpop.xlane.xlu2 %634  ;;  %vm962_vm1 = vweird.f32 %v1419_v1 }
 0x2bb   :  { %v954_v15 = vsel %vm951_vm0, %v953_v29, %v949_v32  ;;  %1420 = vrcp.f32 %v635_v20  ;;  %vm963_vm3 = vmor %vm961_vm2, %vm962_vm1  ;;  %v982_v0 = vand.u32 2147483648, %v635_v20  ;;  %v980_v22 = vand.u32 2147483647, %v635_v20 }
 0x2bc   :  { %v955_v5 = vmul.f32 %v1874_v3, %v954_v15  ;;  %v958_v37 = vsub.f32 1.0, %v957_v13  ;;  %vm976_vm6 = vweird.f32 %v635_v20 }
 0x2bd   :  { %v983_v49 = vor.u32 1.1754944e-38, %v982_v0  ;;  %vm981_vm8 = vcmp.eq.f32.partialorder %v980_v22, 8.507059e+37 }
 0x2be   :  { %1155 = vst [vmem:[%s2059_s5 + $0x98] sm:$0xff] %v955_v5  ;;  %v959_v45 = vmul.f32 %v1419_v1, %v958_v37 }
 0x2c0   :  { %v960_v42 = vadd.f32 %v1419_v1, %v959_v45 }
 0x2c1   :  { %v1421_v8 = vpop.eup %1420 }
 0x2c2   :  { %v964_v44 = vsel %vm963_vm3, %v1419_v1, %v960_v42  ;;  %v972_v39 = vmul.f32 %v1421_v8, %v635_v20  ;;  %v637_v19 = vpop.xlane.xlu0 %636  ;;  %vm977_vm5 = vweird.f32 %v1421_v8 }
 0x2c3   :  { %v969_v54 = vsel %vm966_vm4, %v968_v40, %v964_v44  ;;  %1422 = vrcp.f32 %v637_v19  ;;  %vm978_vm7 = vmor %vm976_vm6, %vm977_vm5  ;;  %v997_v26 = vand.u32 2147483648, %v637_v19  ;;  %v995_v14 = vand.u32 2147483647, %v637_v19 }
 0x2c4   :  { %v970_v3 = vmul.f32 %v1882_v30, %v969_v54  ;;  %v973_v63 = vsub.f32 1.0, %v972_v39  ;;  %vm991_vm10 = vweird.f32 %v637_v19 }
 0x2c5   :  { %v998_v34 = vor.u32 1.1754944e-38, %v997_v26  ;;  %vm996_vm12 = vcmp.eq.f32.partialorder %v995_v14, 8.507059e+37 }
 0x2c6   :  { %1156 = vst [vmem:[%s2059_s5 + $0xa0] sm:$0xff] %v970_v3  ;;  %v974_v58 = vmul.f32 %v1421_v8, %v973_v63 }
 0x2c8   :  { %v975_v59 = vadd.f32 %v1421_v8, %v974_v58 }
 0x2c9   :  { %v1423_v41 = vpop.eup %1422 }
 0x2ca   :  { %v979_v60 = vsel %vm978_vm7, %v1421_v8, %v975_v59  ;;  %v987_v6 = vmul.f32 %v1423_v41, %v637_v19  ;;  %v639_v35 = vpop.xlane.xlu1 %638  ;;  %vm992_vm9 = vweird.f32 %v1423_v41 }
 0x2cb   :  { %v984_v50 = vsel %vm981_vm8, %v983_v49, %v979_v60  ;;  %1424 = vrcp.f32 %v639_v35  ;;  %vm993_vm11 = vmor %vm991_vm10, %vm992_vm9  ;;  %v1012_v52 = vand.u32 2147483648, %v639_v35  ;;  %v1010_v17 = vand.u32 2147483647, %v639_v35 }
 0x2cc   :  { %v985_v30 = vmul.f32 %v1890_v36, %v984_v50  ;;  %v988_v31 = vsub.f32 1.0, %v987_v6  ;;  %vm1006_vm14 = vweird.f32 %v639_v35 }
 0x2cd   :  { %v1013_v57 = vor.u32 1.1754944e-38, %v1012_v52  ;;  %vm1011_vm0 = vcmp.eq.f32.partialorder %v1010_v17, 8.507059e+37 }
 0x2ce   :  { %1157 = vst [vmem:[%s2059_s5 + $0xa8] sm:$0xff] %v985_v30  ;;  %v989_v18 = vmul.f32 %v1423_v41, %v988_v31 }
 0x2d0   :  { %v990_v47 = vadd.f32 %v1423_v41, %v989_v18 }
 0x2d1   :  { %v1425_v38 = vpop.eup %1424 }
 0x2d2   :  { %v994_v7 = vsel %vm993_vm11, %v1423_v41, %v990_v47  ;;  %v1002_v48 = vmul.f32 %v1425_v38, %v639_v35  ;;  %v641_v51 = vpop.xlane.xlu2 %640  ;;  %vm1007_vm13 = vweird.f32 %v1425_v38 }
 0x2d3   :  { %v999_v46 = vsel %vm996_vm12, %v998_v34, %v994_v7  ;;  %1426 = vrcp.f32 %v641_v51  ;;  %vm1008_vm15 = vmor %vm1006_vm14, %vm1007_vm13  ;;  %v1027_v29 = vand.u32 2147483648, %v641_v51  ;;  %v1025_v13 = vand.u32 2147483647, %v641_v51 }
 0x2d4   :  { %v1000_v36 = vmul.f32 %v1898_v53, %v999_v46  ;;  %v1003_v21 = vsub.f32 1.0, %v1002_v48  ;;  %vm1021_vm2 = vweird.f32 %v641_v51 }
 0x2d5   :  { %v1028_v5 = vor.u32 1.1754944e-38, %v1027_v29  ;;  %vm1026_vm4 = vcmp.eq.f32.partialorder %v1025_v13, 8.507059e+37 }
 0x2d6   :  { %1158 = vst [vmem:[%s2059_s5 + $0xb0] sm:$0xff] %v1000_v36  ;;  %v1004_v55 = vmul.f32 %v1425_v38, %v1003_v21 }
 0x2d8   :  { %v1005_v61 = vadd.f32 %v1425_v38, %v1004_v55 }
 0x2d9   :  { %v1427_v4 = vpop.eup %1426 }
 0x2da   :  { %v1009_v62 = vsel %vm1008_vm15, %v1425_v38, %v1005_v61  ;;  %v1017_v27 = vmul.f32 %v1427_v4, %v641_v51  ;;  %v643_v56 = vpop.xlane.xlu0 %642  ;;  %vm1022_vm1 = vweird.f32 %v1427_v4 }
 0x2db   :  { %v1014_v25 = vsel %vm1011_vm0, %v1013_v57, %v1009_v62  ;;  %1428 = vrcp.f32 %v643_v56  ;;  %vm1023_vm3 = vmor %vm1021_vm2, %vm1022_vm1  ;;  %v1042_v8 = vand.u32 2147483648, %v643_v56  ;;  %v1040_v44 = vand.u32 2147483647, %v643_v56 }
 0x2dc   :  { %v1015_v53 = vmul.f32 %v1906_v28, %v1014_v25  ;;  %v1018_v1 = vsub.f32 1.0, %v1017_v27  ;;  %vm1036_vm6 = vweird.f32 %v643_v56 }
 0x2dd   :  { %v1043_v54 = vor.u32 1.1754944e-38, %v1042_v8  ;;  %vm1041_vm8 = vcmp.eq.f32.partialorder %v1040_v44, 8.507059e+37 }
 0x2de   :  { %1159 = vst [vmem:[%s2059_s5 + $0xb8] sm:$0xff] %v1015_v53  ;;  %v1019_v32 = vmul.f32 %v1427_v4, %v1018_v1 }
 0x2e0   :  { %v1020_v20 = vadd.f32 %v1427_v4, %v1019_v32 }
 0x2e1   :  { %v1429_v15 = vpop.eup %1428 }
 0x2e2   :  { %v1024_v37 = vsel %vm1023_vm3, %v1427_v4, %v1020_v20  ;;  %v1032_v43 = vmul.f32 %v1429_v15, %v643_v56  ;;  %v645_v45 = vpop.xlane.xlu1 %644  ;;  %vm1037_vm5 = vweird.f32 %v1429_v15 }
 0x2e3   :  { %v1029_v11 = vsel %vm1026_vm4, %v1028_v5, %v1024_v37  ;;  %1430 = vrcp.f32 %v645_v45  ;;  %vm1038_vm7 = vmor %vm1036_vm6, %vm1037_vm5  ;;  %v1057_v59 = vand.u32 2147483648, %v645_v45  ;;  %v1055_v49 = vand.u32 2147483647, %v645_v45 }
 0x2e4   :  { %v1030_v28 = vmul.f32 %v1914_v24, %v1029_v11  ;;  %v1033_v42 = vsub.f32 1.0, %v1032_v43  ;;  %vm1051_vm10 = vweird.f32 %v645_v45 }
 0x2e5   :  { %v1058_v35 = vor.u32 1.1754944e-38, %v1057_v59  ;;  %vm1056_vm12 = vcmp.eq.f32.partialorder %v1055_v49, 8.507059e+37 }
 0x2e6   :  { %1160 = vst [vmem:[%s2059_s5 + $0xc0] sm:$0xff] %v1030_v28  ;;  %v1034_v40 = vmul.f32 %v1429_v15, %v1033_v42 }
 0x2e8   :  { %v1035_v39 = vadd.f32 %v1429_v15, %v1034_v40 }
 0x2e9   :  { %v1431_v19 = vpop.eup %1430 }
 0x2ea   :  { %v1039_v3 = vsel %vm1038_vm7, %v1429_v15, %v1035_v39  ;;  %v1047_v63 = vmul.f32 %v1431_v19, %v645_v45  ;;  %v647_v0 = vpop.xlane.xlu2 %646  ;;  %vm1052_vm9 = vweird.f32 %v1431_v19 }
 0x2eb   :  { %v1044_v58 = vsel %vm1041_vm8, %v1043_v54, %v1039_v3  ;;  %1432 = vrcp.f32 %v647_v0  ;;  %vm1053_vm11 = vmor %vm1051_vm10, %vm1052_vm9  ;;  %v1072_v14 = vand.u32 2147483648, %v647_v0  ;;  %v1070_v38 = vand.u32 2147483647, %v647_v0 }
 0x2ec   :  { %v1045_v24 = vmul.f32 %v1922_v2, %v1044_v58  ;;  %v1048_v22 = vsub.f32 1.0, %v1047_v63  ;;  %vm1066_vm14 = vweird.f32 %v647_v0 }
 0x2ed   :  { %v1073_v48 = vor.u32 1.1754944e-38, %v1072_v14  ;;  %vm1071_vm0 = vcmp.eq.f32.partialorder %v1070_v38, 8.507059e+37 }
 0x2ee   :  { %1161 = vst [vmem:[%s2059_s5 + $0xc8] sm:$0xff] %v1045_v24  ;;  %v1049_v41 = vmul.f32 %v1431_v19, %v1048_v22 }
 0x2f0   :  { %v1050_v60 = vadd.f32 %v1431_v19, %v1049_v41 }
 0x2f1   :  { %v1433_v6 = vpop.eup %1432 }
 0x2f2   :  { %v1054_v50 = vsel %vm1053_vm11, %v1431_v19, %v1050_v60  ;;  %v1062_v30 = vmul.f32 %v1433_v6, %v647_v0  ;;  %v649_v31 = vpop.xlane.xlu0 %648  ;;  %vm1067_vm13 = vweird.f32 %v1433_v6 }
 0x2f3   :  { %v1059_v26 = vsel %vm1056_vm12, %v1058_v35, %v1054_v50  ;;  %1434 = vrcp.f32 %v649_v31  ;;  %vm1068_vm15 = vmor %vm1066_vm14, %vm1067_vm13  ;;  %v1087_v55 = vand.u32 2147483648, %v649_v31  ;;  %v1085_v61 = vand.u32 2147483647, %v649_v31 }
 0x2f4   :  { %v1060_v2 = vmul.f32 %v1930_v23, %v1059_v26  ;;  %v1063_v18 = vsub.f32 1.0, %v1062_v30  ;;  %vm1081_vm2 = vweird.f32 %v649_v31 }
 0x2f5   :  { %v1088_v62 = vor.u32 1.1754944e-38, %v1087_v55  ;;  %vm1086_vm4 = vcmp.eq.f32.partialorder %v1085_v61, 8.507059e+37 }
 0x2f6   :  { %1162 = vst [vmem:[%s2059_s5 + $0xd0] sm:$0xff] %v1060_v2  ;;  %v1064_v47 = vmul.f32 %v1433_v6, %v1063_v18 }
 0x2f8   :  { %v1065_v34 = vadd.f32 %v1433_v6, %v1064_v47 }
 0x2f9   :  { %v1435_v7 = vpop.eup %1434 }
 0x2fa   :  { %v1069_v51 = vsel %vm1068_vm15, %v1433_v6, %v1065_v34  ;;  %v1077_v46 = vmul.f32 %v1435_v7, %v649_v31  ;;  %v651_v36 = vpop.xlane.xlu1 %650  ;;  %vm1082_vm1 = vweird.f32 %v1435_v7 }
 0x2fb   :  { %v1074_v21 = vsel %vm1071_vm0, %v1073_v48, %v1069_v51  ;;  %1436 = vrcp.f32 %v651_v36  ;;  %vm1083_vm3 = vmor %vm1081_vm2, %vm1082_vm1  ;;  %v1102_v29 = vand.u32 2147483648, %v651_v36  ;;  %v1100_v13 = vand.u32 2147483647, %v651_v36 }
 0x2fc   :  { %v1075_v23 = vmul.f32 %v1938_v10, %v1074_v21  ;;  %v1078_v52 = vsub.f32 1.0, %v1077_v46  ;;  %vm1096_vm6 = vweird.f32 %v651_v36 }
 0x2fd   :  { %v1103_v15 = vor.u32 1.1754944e-38, %v1102_v29  ;;  %vm1101_vm8 = vcmp.eq.f32.partialorder %v1100_v13, 8.507059e+37 }
 0x2fe   :  { %1163 = vst [vmem:[%s2059_s5 + $0xd8] sm:$0xff] %v1075_v23  ;;  %v1079_v17 = vmul.f32 %v1435_v7, %v1078_v52 }
 0x300   :  { %v1080_v4 = vadd.f32 %v1435_v7, %v1079_v17 }
 0x301   :  { %v1437_v57 = vpop.eup %1436 }
 0x302   :  { %v1084_v27 = vsel %vm1083_vm3, %v1435_v7, %v1080_v4  ;;  %v1092_v56 = vmul.f32 %v1437_v57, %v651_v36  ;;  %v653_v53 = vpop.xlane.xlu2 %652  ;;  %vm1097_vm5 = vweird.f32 %v1437_v57 }
 0x303   :  { %v1089_v25 = vsel %vm1086_vm4, %v1088_v62, %v1084_v27  ;;  %1438 = vrcp.f32 %v653_v53  ;;  %vm1098_vm7 = vmor %vm1096_vm6, %vm1097_vm5  ;;  %v1117_v42 = vand.u32 2147483648, %v653_v53  ;;  %v1115_v40 = vand.u32 2147483647, %v653_v53 }
 0x304   :  { %v1090_v10 = vmul.f32 %v1942_v33, %v1089_v25  ;;  %v1093_v1 = vsub.f32 1.0, %v1092_v56  ;;  %vm1111_vm10 = vweird.f32 %v653_v53 }
 0x305   :  { %v1118_v19 = vor.u32 1.1754944e-38, %v1117_v42  ;;  %vm1116_vm12 = vcmp.eq.f32.partialorder %v1115_v40, 8.507059e+37 }
 0x306   :  { %1164 = vst [vmem:[%s2059_s5 + $0xe0] sm:$0xff] %v1090_v10  ;;  %v1094_v32 = vmul.f32 %v1437_v57, %v1093_v1 }
 0x308   :  { %v1095_v20 = vadd.f32 %v1437_v57, %v1094_v32 }
 0x309   :  { %v1439_v5 = vpop.eup %1438 }
 0x30a   :  { %v1099_v37 = vsel %vm1098_vm7, %v1437_v57, %v1095_v20  ;;  %v655_v43 = vpop.xlane.xlu0 %654  ;;  %v1107_v33 = vmul.f32 %v1439_v5, %v653_v53  ;;  %vm1112_vm9 = vweird.f32 %v1439_v5 }
 0x30b   :  { %v1104_v45 = vsel %vm1101_vm8, %v1103_v15, %v1099_v37  ;;  %1440 = vrcp.f32 %v655_v43  ;;  %vm1113_vm11 = vmor %vm1111_vm10, %vm1112_vm9  ;;  %v1132_v58 = vand.u32 2147483648, %v655_v43  ;;  %v1130_v22 = vand.u32 2147483647, %v655_v43 }
 0x30c   :  { %v1105_v11 = vmul.f32 %v1946_v16, %v1104_v45  ;;  %v1108_v28 = vsub.f32 1.0, %v1107_v33  ;;  %vm1126_vm14 = vweird.f32 %v655_v43 }
 0x30d   :  { %v1133_v41 = vor.u32 1.1754944e-38, %v1132_v58  ;;  %vm1131_vm0 = vcmp.eq.f32.partialorder %v1130_v22, 8.507059e+37 }
 0x30e   :  { %1165 = vst [vmem:[%s2059_s5 + $0xe8] sm:$0xff] %v1105_v11  ;;  %v1109_v8 = vmul.f32 %v1439_v5, %v1108_v28 }
 0x310   :  { %v1110_v39 = vadd.f32 %v1439_v5, %v1109_v8 }
 0x311   :  { %v1441_v44 = vpop.eup %1440 }
 0x312   :  { %v1122_v54 = vmul.f32 %v1441_v44, %v655_v43  ;;  %v1114_v3 = vsel %vm1113_vm11, %v1439_v5, %v1110_v39  ;;  %vm1127_vm13 = vweird.f32 %v1441_v44 }
 0x313   :  { %v1119_v63 = vsel %vm1116_vm12, %v1118_v19, %v1114_v3  ;;  %vm1128_vm15 = vmor %vm1126_vm14, %vm1127_vm13 }
 0x314   :  { %v1123_v0 = vsub.f32 1.0, %v1122_v54  ;;  %v1120_v16 = vmul.f32 %v1950_v9, %v1119_v63 }
 0x316   :  { %v1124_v24 = vmul.f32 %v1441_v44, %v1123_v0  ;;  %1166 = vst [vmem:[%s2059_s5 + $0xf0] sm:$0xff] %v1120_v16 }
 0x318   :  { %v1125_v59 = vadd.f32 %v1441_v44, %v1124_v24 }
 0x31a   :  { %v1129_v49 = vsel %vm1128_vm15, %v1441_v44, %v1125_v59 }
 0x31b   :  { %v1134_v60 = vsel %vm1131_vm0, %v1133_v41, %v1129_v49 }
 0x31c   :  { %v1135_v6 = vmul.f32 %v1959_v12, %v1134_v60 }
 0x31e   :  { %1167 = vst [vmem:[%s2059_s5 + $0xf8] sm:$0xff] %v1135_v6 }

</bundles_post_ra>
